<compile_context>
chip_gen: v7x
topology: tpu7x:2x2x1
jax: 0.10.0
libtpu: 0.0.40
codegen_flags: <defaults>
</compile_context>

<pallas_src>
import jax
import jax.numpy as jnp
from jax.experimental import pallas as pl
from jax.experimental.pallas import tpu as pltpu

MODEL_DIM = 64
NUM_HEADS = 4          # head_dim = 16; for S=1 attention the heads fuse back (only V path matters)
NUM_LAYERS = 2
DIM_FF = 2048          # PyTorch TransformerEncoderLayer default dim_feedforward
SEQ = 8
LN_EPS = 1e-5

# row layout of the packed per-layer vector bundle (L, 6, E)
_B_ATTN, _G1, _BE1, _G2, _BE2, _B2 = range(6)


def _layernorm(h, gamma, beta, eps=LN_EPS):
    mu = jnp.mean(h, axis=-1, keepdims=True)
    var = jnp.mean((h - mu) * (h - mu), axis=-1, keepdims=True)
    return (h - mu) * jax.lax.rsqrt(var + eps) * gamma + beta


def encoder_kernel(x_ref, wvo_ref, w1_ref, w2_ref, b1_ref, vec_ref, wfc_ref, bfc_ref,
                   out_ref):
    E = MODEL_DIM
    h = x_ref[...]                                   # (1, E) f32, last token only

    for l in range(NUM_LAYERS):                      # fully unrolled: no grid / pipeline cost
        vec = vec_ref[l]                             # (6, E) f32
        b_attn = vec[_B_ATTN:_B_ATTN + 1, :]
        g1, be1 = vec[_G1:_G1 + 1, :], vec[_BE1:_BE1 + 1, :]
        g2, be2 = vec[_G2:_G2 + 1, :], vec[_BE2:_BE2 + 1, :]
        b2 = vec[_B2:_B2 + 1, :]

        # --- self-attention over a length-1 sequence (softmax == 1); Wv@Wo pre-fused offline.
        # wvo is packed lane-dense (E, L*E) bf16: matmul the full slab, slice layer l's columns.
        attn_all = jnp.dot(h.astype(jnp.bfloat16), wvo_ref[...],
                           preferred_element_type=jnp.float32)              # (1, L*E) f32
        attn = attn_all[:, l * E:(l + 1) * E] + b_attn
        h = _layernorm(h + attn, g1, be1)

        # --- feed-forward; bf16 x bf16 on the MXU, f32 accumulate / residual / LayerNorm ---
        ff = jnp.dot(h.astype(jnp.bfloat16), w1_ref[l],
                     preferred_element_type=jnp.float32) + b1_ref[l:l + 1, :]  # (1, FF) f32
        ff = jnp.maximum(ff, 0.0)
        # w2 packed lane-dense (FF, L*E) bf16: full-slab matmul, slice layer l's 64 columns.
        ff_all = jnp.dot(ff.astype(jnp.bfloat16), w2_ref[...],
                         preferred_element_type=jnp.float32)                 # (1, L*E) f32
        ff = ff_all[:, l * E:(l + 1) * E] + b2
        h = _layernorm(h + ff, g2, be2)

    # --- fc on the last (only) token ---
    out_ref[...] = jnp.dot(h.astype(jnp.bfloat16), wfc_ref[...],
                           preferred_element_type=jnp.float32) + bfc_ref[...]


def time_aware_transformer(x, kparams):
    w_vo, w1, w2, b1, vecs, wfc, bfc = kparams
    E = MODEL_DIM
    # Only the last token feeds fc; rows are independent under S=1 attention -> exact.
    x_last = x[-1:, :]

    vmem = pl.BlockSpec(memory_space=pltpu.MemorySpace.VMEM)   # whole array resident in VMEM
    return pl.pallas_call(
        encoder_kernel,
        out_shape=jax.ShapeDtypeStruct((1, E), jnp.float32),
        in_specs=[vmem, vmem, vmem, vmem, vmem, vmem, vmem, vmem],
        out_specs=vmem,
        compiler_params=pltpu.CompilerParams(vmem_limit_bytes=16 << 20),
    )(x_last, w_vo, w1, w2, b1, vecs, wfc, bfc)


def init_params(key):
    """Deterministic synthetic parameters, mimicking the PyTorch module's shapes,
    pre-transposed from torch (out,in) to (in,out) so everything is x @ W."""
    E, FF, L = MODEL_DIM, DIM_FF, NUM_LAYERS
    ks = jax.random.split(key, 8)

    def w(k, shape, scale=0.02):
        return (scale * jax.random.normal(k, shape)).astype(jnp.float32)

    # nn.MultiheadAttention in_proj_weight is (3E, E); only the V slice [2E:3E] matters for S=1.
    in_proj = w(ks[0], (L, 3 * E, E))
    wv = jnp.transpose(in_proj[:, 2 * E:3 * E, :], (0, 2, 1))          # (L, E, E)
    wo = jnp.transpose(w(ks[1], (L, E, E)), (0, 2, 1))                 # out_proj.weight^T
    w1 = jnp.transpose(w(ks[2], (L, FF, E)), (0, 2, 1)).astype(jnp.bfloat16)  # linear1 (L,E,FF)
    w2 = jnp.transpose(w(ks[3], (L, E, FF)), (0, 2, 1)).astype(jnp.bfloat16)  # linear2 (L,FF,E)
    wfc = w(ks[4], (E, E)).T                                           # fc.weight^T

    bv = w(ks[5], (L, 1, E))
    bo = w(ks[6], (L, 1, E))
    b1 = jnp.zeros((L, 1, FF), jnp.float32)
    b2 = jnp.zeros((L, 1, E), jnp.float32)
    bfc = w(ks[7], (1, E))

    g1 = jnp.ones((L, 1, E), jnp.float32)                              # LayerNorm defaults
    be1 = jnp.zeros((L, 1, E), jnp.float32)
    g2 = jnp.ones((L, 1, E), jnp.float32)
    be2 = jnp.zeros((L, 1, E), jnp.float32)

    return dict(wv=wv, bv=bv, wo=wo, bo=bo, g1=g1, be1=be1, g2=g2, be2=be2,
                w1=w1, b1=b1, w2=w2, b2=b2, wfc=wfc, bfc=bfc)


def prepare_kernel_params(p):
    """Offline folding/packing.  softmax==1 makes attention a single affine map per layer;
    per-layer (.., E) weights are packed along the output dim so the minor dim is 128 (lane
    dense, no padding DMA); everything matmul-shaped is stored bf16."""
    E, FF, L = MODEL_DIM, DIM_FF, NUM_LAYERS
    hi = jax.lax.Precision.HIGHEST

    w_vo = jnp.einsum('lij,ljk->lik', p['wv'], p['wo'], precision=hi)              # (L, E, E) f32
    b_attn = jnp.einsum('lij,ljk->lik', p['bv'], p['wo'], precision=hi) + p['bo']  # (L, 1, E)

    # pack both layers along the output dim -> lane-dense minor dim of L*E = 128
    w_vo_packed = jnp.concatenate([w_vo[l] for l in range(L)], axis=1).astype(jnp.bfloat16)  # (E, L*E)
    w2_packed = jnp.concatenate([p['w2'][l] for l in range(L)], axis=1)                      # (FF, L*E) bf16

    w1 = p['w1']                                                       # (L, E, FF) bf16, already lane-dense
    b1 = p['b1'].reshape(L, FF)                                        # (L, FF) f32, one DMA
    wfc = p['wfc'].astype(jnp.bfloat16)                                # (E, E) bf16
    bfc = p['bfc']                                                     # (1, E) f32

    vecs = jnp.concatenate(
        [b_attn, p['g1'], p['be1'], p['g2'], p['be2'], p['b2']], axis=1)            # (L, 6, E) f32

    return (w_vo_packed, w1, w2_packed, b1, vecs, wfc, bfc)


def reference(x, p):
    """Pure-JAX, unfused, full-sequence reference of the same math (f32, high precision)."""
    hi = jax.lax.Precision.HIGHEST
    dot = lambda a, b: jnp.dot(a, b, precision=hi)
    w1 = p['w1'].astype(jnp.float32)
    w2 = p['w2'].astype(jnp.float32)
    h = x
    for l in range(NUM_LAYERS):
        attn = dot(dot(h, p['wv'][l]) + p['bv'][l], p['wo'][l]) + p['bo'][l]
        h = _layernorm(h + attn, p['g1'][l], p['be1'][l])
        ff = dot(jnp.maximum(dot(h, w1[l]) + p['b1'][l], 0.0), w2[l]) + p['b2'][l]
        h = _layernorm(h + ff, p['g2'][l], p['be2'][l])
    return dot(h[-1:, :], p['wfc']) + p['bfc']


if __name__ == "__main__":
    key = jax.random.PRNGKey(0)
    kx, kp = jax.random.split(key)
    x = jax.random.normal(kx, (SEQ, MODEL_DIM), dtype=jnp.float32)  # input_dim == model_dim here
    raw = init_params(kp)
    kparams = prepare_kernel_params(raw)

    out = jax.block_until_ready(time_aware_transformer(x, kparams))
    ref = reference(x, raw)

    assert out.shape == (1, MODEL_DIM)
    # Tolerance covers bf16 weight storage + bf16 activation rounding at the MXU inputs and
    # the offline Wv@Wo reassociation (reference is f32 end-to-end).
    err = float(jnp.max(jnp.abs(out - ref)))
    assert jnp.allclose(out, ref, atol=1e-2, rtol=1e-2), err
    print("KERNEL_OK")
</pallas_src>

<mosaic_0001>
module attributes {stable_mosaic.version = 11 : i64} {
  func.func @encoder_kernel(%arg0: memref<1x64xf32, #tpu.memory_space<vmem>>, %arg1: memref<64x128xbf16, #tpu.memory_space<vmem>>, %arg2: memref<2x64x2048xbf16, #tpu.memory_space<vmem>>, %arg3: memref<2048x128xbf16, #tpu.memory_space<vmem>>, %arg4: memref<2x2048xf32, #tpu.memory_space<vmem>>, %arg5: memref<2x6x64xf32, #tpu.memory_space<vmem>>, %arg6: memref<64x64xbf16, #tpu.memory_space<vmem>>, %arg7: memref<1x64xf32, #tpu.memory_space<vmem>>, %arg8: memref<1x64xf32, #tpu.memory_space<vmem>>) attributes {dimension_semantics = [], scalar_prefetch = 0 : i64, scratch_operands = 0 : i64, tpu.core_type = #tpu.core_type<tc>} {
    %c0 = arith.constant 0 : index
    %c0_0 = arith.constant 0 : index
    %0 = vector.load %arg0[%c0, %c0_0] : memref<1x64xf32, #tpu.memory_space<vmem>>, vector<1x64xf32>
    %c0_1 = arith.constant 0 : index
    %c0_2 = arith.constant 0 : index
    %c0_3 = arith.constant 0 : index
    %1 = vector.load %arg5[%c0_1, %c0_2, %c0_3] : memref<2x6x64xf32, #tpu.memory_space<vmem>>, vector<1x6x64xf32>
    %2 = vector.shape_cast %1 : vector<1x6x64xf32> to vector<6x64xf32>
    %3 = vector.extract_strided_slice %2 {offsets = [0, 0], sizes = [1, 64], strides = [1, 1]} : vector<6x64xf32> to vector<1x64xf32>
    %4 = vector.extract_strided_slice %2 {offsets = [1, 0], sizes = [1, 64], strides = [1, 1]} : vector<6x64xf32> to vector<1x64xf32>
    %5 = vector.extract_strided_slice %2 {offsets = [2, 0], sizes = [1, 64], strides = [1, 1]} : vector<6x64xf32> to vector<1x64xf32>
    %6 = vector.extract_strided_slice %2 {offsets = [3, 0], sizes = [1, 64], strides = [1, 1]} : vector<6x64xf32> to vector<1x64xf32>
    %7 = vector.extract_strided_slice %2 {offsets = [4, 0], sizes = [1, 64], strides = [1, 1]} : vector<6x64xf32> to vector<1x64xf32>
    %8 = vector.extract_strided_slice %2 {offsets = [5, 0], sizes = [1, 64], strides = [1, 1]} : vector<6x64xf32> to vector<1x64xf32>
    %9 = arith.truncf %0 : vector<1x64xf32> to vector<1x64xbf16>
    %c0_4 = arith.constant 0 : index
    %c0_5 = arith.constant 0 : index
    %10 = vector.load %arg1[%c0_4, %c0_5] : memref<64x128xbf16, #tpu.memory_space<vmem>>, vector<64x128xbf16>
    %cst = arith.constant dense<0.000000e+00> : vector<1x128xf32>
    %11 = tpu.matmul %9, %10, %cst {dimension_numbers = #tpu.dot_dimension_numbers<[1], [0], [0], [1], [0, 0, 1, 1], [], []>} : vector<1x64xbf16>, vector<64x128xbf16>, vector<1x128xf32> -> vector<1x128xf32>
    %12 = vector.extract_strided_slice %11 {offsets = [0, 0], sizes = [1, 64], strides = [1, 1]} : vector<1x128xf32> to vector<1x64xf32>
    %13 = arith.addf %12, %3 : vector<1x64xf32>
    %14 = arith.addf %0, %13 : vector<1x64xf32>
    %cst_6 = arith.constant dense<0.000000e+00> : vector<1xf32>
    %15 = vector.multi_reduction <add>, %14, %cst_6 [1] : vector<1x64xf32> to vector<1xf32>
    %16 = vector.shape_cast %15 : vector<1xf32> to vector<1x1xf32>
    %cst_7 = arith.constant 6.400000e+01 : f32
    %17 = vector.broadcast %cst_7 : f32 to vector<1x1xf32>
    %18 = arith.divf %16, %17 : vector<1x1xf32>
    %19 = vector.broadcast %18 : vector<1x1xf32> to vector<1x64xf32>
    %20 = arith.subf %14, %19 : vector<1x64xf32>
    %21 = vector.broadcast %18 : vector<1x1xf32> to vector<1x64xf32>
    %22 = arith.subf %14, %21 : vector<1x64xf32>
    %23 = arith.mulf %20, %22 : vector<1x64xf32>
    %cst_8 = arith.constant dense<0.000000e+00> : vector<1xf32>
    %24 = vector.multi_reduction <add>, %23, %cst_8 [1] : vector<1x64xf32> to vector<1xf32>
    %25 = vector.shape_cast %24 : vector<1xf32> to vector<1x1xf32>
    %cst_9 = arith.constant 6.400000e+01 : f32
    %26 = vector.broadcast %cst_9 : f32 to vector<1x1xf32>
    %27 = arith.divf %25, %26 : vector<1x1xf32>
    %28 = vector.broadcast %18 : vector<1x1xf32> to vector<1x64xf32>
    %29 = arith.subf %14, %28 : vector<1x64xf32>
    %cst_10 = arith.constant 9.99999974E-6 : f32
    %30 = vector.broadcast %cst_10 : f32 to vector<1x1xf32>
    %31 = arith.addf %27, %30 : vector<1x1xf32>
    %32 = math.rsqrt %31 : vector<1x1xf32>
    %33 = vector.broadcast %32 : vector<1x1xf32> to vector<1x64xf32>
    %34 = arith.mulf %29, %33 : vector<1x64xf32>
    %35 = arith.mulf %34, %4 : vector<1x64xf32>
    %36 = arith.addf %35, %5 : vector<1x64xf32>
    %37 = arith.truncf %36 : vector<1x64xf32> to vector<1x64xbf16>
    %c0_11 = arith.constant 0 : index
    %c0_12 = arith.constant 0 : index
    %c0_13 = arith.constant 0 : index
    %38 = vector.load %arg2[%c0_11, %c0_12, %c0_13] : memref<2x64x2048xbf16, #tpu.memory_space<vmem>>, vector<1x64x2048xbf16>
    %39 = vector.shape_cast %38 : vector<1x64x2048xbf16> to vector<64x2048xbf16>
    %cst_14 = arith.constant dense<0.000000e+00> : vector<1x2048xf32>
    %40 = tpu.matmul %37, %39, %cst_14 {dimension_numbers = #tpu.dot_dimension_numbers<[1], [0], [0], [1], [0, 0, 1, 1], [], []>} : vector<1x64xbf16>, vector<64x2048xbf16>, vector<1x2048xf32> -> vector<1x2048xf32>
    %c0_15 = arith.constant 0 : index
    %c0_16 = arith.constant 0 : index
    %41 = vector.load %arg4[%c0_15, %c0_16] : memref<2x2048xf32, #tpu.memory_space<vmem>>, vector<1x2048xf32>
    %42 = arith.addf %40, %41 : vector<1x2048xf32>
    %cst_17 = arith.constant 0.000000e+00 : f32
    %43 = vector.broadcast %cst_17 : f32 to vector<1x2048xf32>
    %44 = arith.maximumf %42, %43 : vector<1x2048xf32>
    %45 = arith.truncf %44 : vector<1x2048xf32> to vector<1x2048xbf16>
    %c0_18 = arith.constant 0 : index
    %c0_19 = arith.constant 0 : index
    %46 = vector.load %arg3[%c0_18, %c0_19] : memref<2048x128xbf16, #tpu.memory_space<vmem>>, vector<2048x128xbf16>
    %cst_20 = arith.constant dense<0.000000e+00> : vector<1x128xf32>
    %47 = tpu.matmul %45, %46, %cst_20 {dimension_numbers = #tpu.dot_dimension_numbers<[1], [0], [0], [1], [0, 0, 1, 1], [], []>} : vector<1x2048xbf16>, vector<2048x128xbf16>, vector<1x128xf32> -> vector<1x128xf32>
    %48 = vector.extract_strided_slice %47 {offsets = [0, 0], sizes = [1, 64], strides = [1, 1]} : vector<1x128xf32> to vector<1x64xf32>
    %49 = arith.addf %48, %8 : vector<1x64xf32>
    %50 = arith.addf %36, %49 : vector<1x64xf32>
    %cst_21 = arith.constant dense<0.000000e+00> : vector<1xf32>
    %51 = vector.multi_reduction <add>, %50, %cst_21 [1] : vector<1x64xf32> to vector<1xf32>
    %52 = vector.shape_cast %51 : vector<1xf32> to vector<1x1xf32>
    %cst_22 = arith.constant 6.400000e+01 : f32
    %53 = vector.broadcast %cst_22 : f32 to vector<1x1xf32>
    %54 = arith.divf %52, %53 : vector<1x1xf32>
    %55 = vector.broadcast %54 : vector<1x1xf32> to vector<1x64xf32>
    %56 = arith.subf %50, %55 : vector<1x64xf32>
    %57 = vector.broadcast %54 : vector<1x1xf32> to vector<1x64xf32>
    %58 = arith.subf %50, %57 : vector<1x64xf32>
    %59 = arith.mulf %56, %58 : vector<1x64xf32>
    %cst_23 = arith.constant dense<0.000000e+00> : vector<1xf32>
    %60 = vector.multi_reduction <add>, %59, %cst_23 [1] : vector<1x64xf32> to vector<1xf32>
    %61 = vector.shape_cast %60 : vector<1xf32> to vector<1x1xf32>
    %cst_24 = arith.constant 6.400000e+01 : f32
    %62 = vector.broadcast %cst_24 : f32 to vector<1x1xf32>
    %63 = arith.divf %61, %62 : vector<1x1xf32>
    %64 = vector.broadcast %54 : vector<1x1xf32> to vector<1x64xf32>
    %65 = arith.subf %50, %64 : vector<1x64xf32>
    %cst_25 = arith.constant 9.99999974E-6 : f32
    %66 = vector.broadcast %cst_25 : f32 to vector<1x1xf32>
    %67 = arith.addf %63, %66 : vector<1x1xf32>
    %68 = math.rsqrt %67 : vector<1x1xf32>
    %69 = vector.broadcast %68 : vector<1x1xf32> to vector<1x64xf32>
    %70 = arith.mulf %65, %69 : vector<1x64xf32>
    %71 = arith.mulf %70, %6 : vector<1x64xf32>
    %72 = arith.addf %71, %7 : vector<1x64xf32>
    %c1 = arith.constant 1 : index
    %c0_26 = arith.constant 0 : index
    %c0_27 = arith.constant 0 : index
    %73 = vector.load %arg5[%c1, %c0_26, %c0_27] : memref<2x6x64xf32, #tpu.memory_space<vmem>>, vector<1x6x64xf32>
    %74 = vector.shape_cast %73 : vector<1x6x64xf32> to vector<6x64xf32>
    %75 = vector.extract_strided_slice %74 {offsets = [0, 0], sizes = [1, 64], strides = [1, 1]} : vector<6x64xf32> to vector<1x64xf32>
    %76 = vector.extract_strided_slice %74 {offsets = [1, 0], sizes = [1, 64], strides = [1, 1]} : vector<6x64xf32> to vector<1x64xf32>
    %77 = vector.extract_strided_slice %74 {offsets = [2, 0], sizes = [1, 64], strides = [1, 1]} : vector<6x64xf32> to vector<1x64xf32>
    %78 = vector.extract_strided_slice %74 {offsets = [3, 0], sizes = [1, 64], strides = [1, 1]} : vector<6x64xf32> to vector<1x64xf32>
    %79 = vector.extract_strided_slice %74 {offsets = [4, 0], sizes = [1, 64], strides = [1, 1]} : vector<6x64xf32> to vector<1x64xf32>
    %80 = vector.extract_strided_slice %74 {offsets = [5, 0], sizes = [1, 64], strides = [1, 1]} : vector<6x64xf32> to vector<1x64xf32>
    %81 = arith.truncf %72 : vector<1x64xf32> to vector<1x64xbf16>
    %c0_28 = arith.constant 0 : index
    %c0_29 = arith.constant 0 : index
    %82 = vector.load %arg1[%c0_28, %c0_29] : memref<64x128xbf16, #tpu.memory_space<vmem>>, vector<64x128xbf16>
    %cst_30 = arith.constant dense<0.000000e+00> : vector<1x128xf32>
    %83 = tpu.matmul %81, %82, %cst_30 {dimension_numbers = #tpu.dot_dimension_numbers<[1], [0], [0], [1], [0, 0, 1, 1], [], []>} : vector<1x64xbf16>, vector<64x128xbf16>, vector<1x128xf32> -> vector<1x128xf32>
    %84 = vector.extract_strided_slice %83 {offsets = [0, 64], sizes = [1, 64], strides = [1, 1]} : vector<1x128xf32> to vector<1x64xf32>
    %85 = arith.addf %84, %75 : vector<1x64xf32>
    %86 = arith.addf %72, %85 : vector<1x64xf32>
    %cst_31 = arith.constant dense<0.000000e+00> : vector<1xf32>
    %87 = vector.multi_reduction <add>, %86, %cst_31 [1] : vector<1x64xf32> to vector<1xf32>
    %88 = vector.shape_cast %87 : vector<1xf32> to vector<1x1xf32>
    %cst_32 = arith.constant 6.400000e+01 : f32
    %89 = vector.broadcast %cst_32 : f32 to vector<1x1xf32>
    %90 = arith.divf %88, %89 : vector<1x1xf32>
    %91 = vector.broadcast %90 : vector<1x1xf32> to vector<1x64xf32>
    %92 = arith.subf %86, %91 : vector<1x64xf32>
    %93 = vector.broadcast %90 : vector<1x1xf32> to vector<1x64xf32>
    %94 = arith.subf %86, %93 : vector<1x64xf32>
    %95 = arith.mulf %92, %94 : vector<1x64xf32>
    %cst_33 = arith.constant dense<0.000000e+00> : vector<1xf32>
    %96 = vector.multi_reduction <add>, %95, %cst_33 [1] : vector<1x64xf32> to vector<1xf32>
    %97 = vector.shape_cast %96 : vector<1xf32> to vector<1x1xf32>
    %cst_34 = arith.constant 6.400000e+01 : f32
    %98 = vector.broadcast %cst_34 : f32 to vector<1x1xf32>
    %99 = arith.divf %97, %98 : vector<1x1xf32>
    %100 = vector.broadcast %90 : vector<1x1xf32> to vector<1x64xf32>
    %101 = arith.subf %86, %100 : vector<1x64xf32>
    %cst_35 = arith.constant 9.99999974E-6 : f32
    %102 = vector.broadcast %cst_35 : f32 to vector<1x1xf32>
    %103 = arith.addf %99, %102 : vector<1x1xf32>
    %104 = math.rsqrt %103 : vector<1x1xf32>
    %105 = vector.broadcast %104 : vector<1x1xf32> to vector<1x64xf32>
    %106 = arith.mulf %101, %105 : vector<1x64xf32>
    %107 = arith.mulf %106, %76 : vector<1x64xf32>
    %108 = arith.addf %107, %77 : vector<1x64xf32>
    %109 = arith.truncf %108 : vector<1x64xf32> to vector<1x64xbf16>
    %c1_36 = arith.constant 1 : index
    %c0_37 = arith.constant 0 : index
    %c0_38 = arith.constant 0 : index
    %110 = vector.load %arg2[%c1_36, %c0_37, %c0_38] : memref<2x64x2048xbf16, #tpu.memory_space<vmem>>, vector<1x64x2048xbf16>
    %111 = vector.shape_cast %110 : vector<1x64x2048xbf16> to vector<64x2048xbf16>
    %cst_39 = arith.constant dense<0.000000e+00> : vector<1x2048xf32>
    %112 = tpu.matmul %109, %111, %cst_39 {dimension_numbers = #tpu.dot_dimension_numbers<[1], [0], [0], [1], [0, 0, 1, 1], [], []>} : vector<1x64xbf16>, vector<64x2048xbf16>, vector<1x2048xf32> -> vector<1x2048xf32>
    %c1_40 = arith.constant 1 : index
    %c0_41 = arith.constant 0 : index
    %113 = vector.load %arg4[%c1_40, %c0_41] : memref<2x2048xf32, #tpu.memory_space<vmem>>, vector<1x2048xf32>
    %114 = arith.addf %112, %113 : vector<1x2048xf32>
    %cst_42 = arith.constant 0.000000e+00 : f32
    %115 = vector.broadcast %cst_42 : f32 to vector<1x2048xf32>
    %116 = arith.maximumf %114, %115 : vector<1x2048xf32>
    %117 = arith.truncf %116 : vector<1x2048xf32> to vector<1x2048xbf16>
    %c0_43 = arith.constant 0 : index
    %c0_44 = arith.constant 0 : index
    %118 = vector.load %arg3[%c0_43, %c0_44] : memref<2048x128xbf16, #tpu.memory_space<vmem>>, vector<2048x128xbf16>
    %cst_45 = arith.constant dense<0.000000e+00> : vector<1x128xf32>
    %119 = tpu.matmul %117, %118, %cst_45 {dimension_numbers = #tpu.dot_dimension_numbers<[1], [0], [0], [1], [0, 0, 1, 1], [], []>} : vector<1x2048xbf16>, vector<2048x128xbf16>, vector<1x128xf32> -> vector<1x128xf32>
    %120 = vector.extract_strided_slice %119 {offsets = [0, 64], sizes = [1, 64], strides = [1, 1]} : vector<1x128xf32> to vector<1x64xf32>
    %121 = arith.addf %120, %80 : vector<1x64xf32>
    %122 = arith.addf %108, %121 : vector<1x64xf32>
    %cst_46 = arith.constant dense<0.000000e+00> : vector<1xf32>
    %123 = vector.multi_reduction <add>, %122, %cst_46 [1] : vector<1x64xf32> to vector<1xf32>
    %124 = vector.shape_cast %123 : vector<1xf32> to vector<1x1xf32>
    %cst_47 = arith.constant 6.400000e+01 : f32
    %125 = vector.broadcast %cst_47 : f32 to vector<1x1xf32>
    %126 = arith.divf %124, %125 : vector<1x1xf32>
    %127 = vector.broadcast %126 : vector<1x1xf32> to vector<1x64xf32>
    %128 = arith.subf %122, %127 : vector<1x64xf32>
    %129 = vector.broadcast %126 : vector<1x1xf32> to vector<1x64xf32>
    %130 = arith.subf %122, %129 : vector<1x64xf32>
    %131 = arith.mulf %128, %130 : vector<1x64xf32>
    %cst_48 = arith.constant dense<0.000000e+00> : vector<1xf32>
    %132 = vector.multi_reduction <add>, %131, %cst_48 [1] : vector<1x64xf32> to vector<1xf32>
    %133 = vector.shape_cast %132 : vector<1xf32> to vector<1x1xf32>
    %cst_49 = arith.constant 6.400000e+01 : f32
    %134 = vector.broadcast %cst_49 : f32 to vector<1x1xf32>
    %135 = arith.divf %133, %134 : vector<1x1xf32>
    %136 = vector.broadcast %126 : vector<1x1xf32> to vector<1x64xf32>
    %137 = arith.subf %122, %136 : vector<1x64xf32>
    %cst_50 = arith.constant 9.99999974E-6 : f32
    %138 = vector.broadcast %cst_50 : f32 to vector<1x1xf32>
    %139 = arith.addf %135, %138 : vector<1x1xf32>
    %140 = math.rsqrt %139 : vector<1x1xf32>
    %141 = vector.broadcast %140 : vector<1x1xf32> to vector<1x64xf32>
    %142 = arith.mulf %137, %141 : vector<1x64xf32>
    %143 = arith.mulf %142, %78 : vector<1x64xf32>
    %144 = arith.addf %143, %79 : vector<1x64xf32>
    %145 = arith.truncf %144 : vector<1x64xf32> to vector<1x64xbf16>
    %c0_51 = arith.constant 0 : index
    %c0_52 = arith.constant 0 : index
    %146 = vector.load %arg6[%c0_51, %c0_52] : memref<64x64xbf16, #tpu.memory_space<vmem>>, vector<64x64xbf16>
    %cst_53 = arith.constant dense<0.000000e+00> : vector<1x64xf32>
    %147 = tpu.matmul %145, %146, %cst_53 {dimension_numbers = #tpu.dot_dimension_numbers<[1], [0], [0], [1], [0, 0, 1, 1], [], []>} : vector<1x64xbf16>, vector<64x64xbf16>, vector<1x64xf32> -> vector<1x64xf32>
    %c0_54 = arith.constant 0 : index
    %c0_55 = arith.constant 0 : index
    %148 = vector.load %arg7[%c0_54, %c0_55] : memref<1x64xf32, #tpu.memory_space<vmem>>, vector<1x64xf32>
    %149 = arith.addf %147, %148 : vector<1x64xf32>
    %c0_56 = arith.constant 0 : index
    %c0_57 = arith.constant 0 : index
    %150 = vector.load %arg8[%c0_56, %c0_57] : memref<1x64xf32, #tpu.memory_space<vmem>>, vector<1x64xf32>
    tpu.vector_store %arg8[%c0_56, %c0_57], %149 {strides = array<i32>} : memref<1x64xf32, #tpu.memory_space<vmem>>, vector<1x64xf32>,
    return
  }
}

</mosaic_0001>

<bundles_post_ra>
// kernel: tpu_custom_call.1
= control target key start
LH: loop header
LB: loop body
LE: loop exit
PB: predicated region body
PF: predicated region fallthrough
CT: control target
= control target key end

     0   :  { %13 = vsyncpa [#allocation3], 0  ;;  %s5362_s0 = inlined_call_operand.vmem [shape: f32[1,64], index: 0, kind: input, shape index: {}]   ;;  %s5363_s1 = inlined_call_operand.hbm [shape: bf16[64,128], index: 1, kind: input, shape index: {}]   ;;  %s5364_s2 = inlined_call_operand.hbm [shape: bf16[2,64,2048], index: 2, kind: input, shape index: {}]   ;;  %s5365_s3 = inlined_call_operand.hbm [shape: bf16[2048,128], index: 3, kind: input, shape index: {}]   ;;  %s5366_s4 = inlined_call_operand.vmem [shape: f32[2,2048], index: 4, kind: input, shape index: {}]   ;;  %s5367_s5 = inlined_call_operand.vmem [shape: f32[2,6,64], index: 5, kind: input, shape index: {}]   ;;  %s5368_s6 = inlined_call_operand.hbm [shape: bf16[64,64], index: 6, kind: input, shape index: {}]   ;;  %s5369_s7 = inlined_call_operand.vmem [shape: f32[1,64], index: 7, kind: input, shape index: {}]   ;;  %s5370_s8 = inlined_call_operand.hbm [shape: f32[1,64], index: 8, kind: output, shape index: {}]  }
   0x1   :  { %14 = vsyncpa [#allocation6], 0 }
   0x2   :  { %15 = vsyncpa [#allocation9], 0 }
   0x3   :  { %16 = vsyncpa [#allocation4], 0  ;;  %s4941_s27 = smov [#allocation5]   ;;  %s4823_s9 = scalar_lea.hbm %s5364_s2, 16384 }
   0x4   :  { %s36_s28 = sshll.u32 %s4941_s27, 4  ;;  %p4824_p0 = scmp.ne.s32.totalorder %s5364_s2, %s4823_s9  ;;  %s37_s28 = int_to_ptr.vmem [resolvable:$true] %s36_s28 }
   0x5   :  { %p4827_p1 = scmp.lt.u32.totalorder %s4823_s9, %s5364_s2 }
   0x7   :  { %p4829_p2 = pnand %p4827_p1, %p4824_p0 }
   0x9   :  { %4832 = shalt.err (!%p4829_p2)
}
   0xa   :  { %s4833_s14 = scalar_lea.vmem %s37_s28, 16384  ;;  %p4838_p4 = scmp.lt.s32.totalorder %s37_s28, %s37_s28 }
   0xb   :  { %p4834_p3 = scmp.ne.s32.totalorder %s37_s28, %s4833_s14  ;;  %p4839_p5 = scmp.lt.s32.totalorder %s4833_s14, %s4833_s14 }
   0xd   :  { %p4840_p6 = por %p4839_p5, %p4838_p4 }
   0xf   :  { %p4841_p7 = pnand %p4840_p6, %p4834_p3 }
  0x11   :  { %4844 = shalt.err (!%p4841_p7)
}
  0x12   :  { %s4942_s15 = smov 1024   ;;  %s4943_s16 = smov 64  }
  0x13   :  { %42 = dma.hbm_to_vmem [thread:$0]  %s5364_s2, 16384, %s37_s28, [#allocation6], %s4942_s15, %s4942_s15, %s4943_s16  }
  0x14   :  { %s4944_s19 = smov [#allocation2]   ;;  %s4845_s23 = scalar_lea.hbm %s5363_s1, 512 }
  0x15   :  { %s24_s20 = sshll.u32 %s4944_s19, 4  ;;  %p4846_p8 = scmp.ne.s32.totalorder %s5363_s1, %s4845_s23  ;;  %s25_s20 = int_to_ptr.vmem [resolvable:$true] %s24_s20 }
  0x16   :  { %p4849_p9 = scmp.lt.u32.totalorder %s4845_s23, %s5363_s1 }
  0x18   :  { %p4851_p10 = pnand %p4849_p9, %p4846_p8 }
  0x1a   :  { %4854 = shalt.err (!%p4851_p10)
}
  0x1b   :  { %s4855_s29 = scalar_lea.vmem %s25_s20, 512  ;;  %p4860_p12 = scmp.lt.s32.totalorder %s25_s20, %s25_s20 }
  0x1c   :  { %p4856_p11 = scmp.ne.s32.totalorder %s25_s20, %s4855_s29  ;;  %p4861_p13 = scmp.lt.s32.totalorder %s4855_s29, %s4855_s29 }
  0x1e   :  { %p4862_p0 = por %p4861_p13, %p4860_p12 }
  0x20   :  { %p4863_p1 = pnand %p4862_p0, %p4856_p11 }
  0x22   :  { %4866 = shalt.err (!%p4863_p1)
}
  0x23   :  { %s4945_s2 = smov 4   ;;  %s4946_s9 = smov [#allocation7]  }
  0x24   :  { %30 = dma.hbm_to_vmem [thread:$0]  %s5363_s1, 512, %s25_s20, [#allocation3], %s4943_s16, %s4943_s16, %s4945_s2  }
  0x25   :  { %s48_s10 = sshll.u32 %s4946_s9, 4  ;;  %s4947_s11 = smov [#allocation8]   ;;  %s49_s10 = int_to_ptr.vmem [resolvable:$true] %s48_s10 }
  0x26   :  { %s64_s12 = sshll.u32 %s4947_s11, 4  ;;  %s4867_s15 = scalar_lea.hbm %s5365_s3, 16384  ;;  %s65_s12 = int_to_ptr.vmem [resolvable:$true] %s64_s12 }
  0x27   :  { %p4868_p2 = scmp.ne.s32.totalorder %s5365_s3, %s4867_s15  ;;  %p4871_p3 = scmp.lt.u32.totalorder %s4867_s15, %s5365_s3 }
  0x29   :  { %p4873_p4 = pnand %p4871_p3, %p4868_p2 }
  0x2b   :  { %4876 = shalt.err (!%p4873_p4)
}
  0x2c   :  { %s4877_s1 = scalar_lea.vmem %s49_s10, 16384  ;;  %p4882_p6 = scmp.lt.s32.totalorder %s49_s10, %s49_s10 }
  0x2d   :  { %p4878_p5 = scmp.ne.s32.totalorder %s49_s10, %s4877_s1  ;;  %p4883_p7 = scmp.lt.s32.totalorder %s4877_s1, %s4877_s1 }
  0x2f   :  { %p4884_p8 = por %p4883_p7, %p4882_p6 }
  0x31   :  { %p4885_p9 = pnand %p4884_p8, %p4878_p5 }
  0x33   :  { %4888 = shalt.err (!%p4885_p9)
}
  0x34   :  { %54 = dma.hbm_to_vmem [thread:$0]  %s5365_s3, 16384, %s49_s10, [#allocation6], %s4943_s16, %s4943_s16, %s4945_s2  }
  0x35   :  { %s4889_s25 = scalar_lea.hbm %s5368_s6, 512 }
  0x36   :  { %p4890_p10 = scmp.ne.s32.totalorder %s5368_s6, %s4889_s25  ;;  %p4893_p11 = scmp.lt.u32.totalorder %s4889_s25, %s5368_s6 }
  0x38   :  { %p4895_p12 = pnand %p4893_p11, %p4890_p10 }
  0x3a   :  { %4898 = shalt.err (!%p4895_p12)
}
  0x3b   :  { %s4899_s30 = scalar_lea.vmem %s65_s12, 512  ;;  %p4904_p0 = scmp.lt.s32.totalorder %s65_s12, %s65_s12 }
  0x3c   :  { %p4900_p13 = scmp.ne.s32.totalorder %s65_s12, %s4899_s30  ;;  %p4905_p1 = scmp.lt.s32.totalorder %s4899_s30, %s4899_s30 }
  0x3e   :  { %p4906_p2 = por %p4905_p1, %p4904_p0 }
  0x40   :  { %p4907_p3 = pnand %p4906_p2, %p4900_p13 }
  0x42   :  { %4910 = shalt.err (!%p4907_p3)
}
  0x43   :  { %70 = dma.hbm_to_vmem [thread:$0]  %s5368_s6, 512, %s65_s12, [#allocation9], %s4943_s16, %s4943_s16, %s4945_s2  }
  0x44   :  { %4933 = dma.done.wait [#allocation3], 512  }
  0x45   :  { %4934 = vsyncadd [#allocation3], 4294966784 }
  0x46   :  { %4935 = dma.done.wait [#allocation6], 32768  }
  0x47   :  { %4936 = vsyncadd [#allocation6], 4294934528 }
  0x48   :  { %4937 = dma.done.wait [#allocation9], 512  }
  0x49   :  { %4938 = vsyncadd [#allocation9], 4294966784  ;;  %v4948_v0 = vmov 0.0   ;;  %vm4949_vm0 = vmmov 0   ;;  %v4543_v1 = vld [vmem:[#allocation2] sm:$0xff]   ;;  %v4544_v2 = vld [vmem:[#allocation2 + $0x8] sm:$0xff]   ;;  %v186_v63 = vlaneseq }
  0x4a   :  { %4495 = vmatprep.subr.bf16.mxu0 %v4948_v0  ;;  %4503 = vmatprep.mubr.msk.bf16.mxu0 %vm4949_vm0, %v4948_v0  ;;  %v4545_v3 = vld [vmem:[#allocation2 + $0x10] sm:$0xff]   ;;  %vm121_vm1 = vcmask 523264   ;;  %v4546_v4 = vld [vmem:[#allocation2 + $0x18] sm:$0xff]   ;;  %v86_v5 = vld [vmem:[%s5362_s0] sm:$0x1]  ;;  %vm167_vm2 = vcmask 516096  }
  0x4b   :  { %4496 = vmatpush3.bf16.msra.mxu0 %v4543_v1  ;;  %v88_v6 = vpack.c.bf16 %v86_v5, %v86_v5  ;;  %v5069_v7 = vld [vmem:[%s5367_s5] sm:$0x3f]  ;;  %v212_v22 = vld [vmem:[#allocation5 + $0x8] sm:$0xff]  ;;  %v213_v52 = vld [vmem:[#allocation5 + $0x10] sm:$0xff]  ;;  %v4950_v60 = vmov 0  }
  0x4c   :  { %4497 = vmatprep.subr.bf16.mxu0 %v4948_v0  ;;  %v211_v20 = vld [vmem:[#allocation5] sm:$0xff]  ;;  %v220_v24 = vld [vmem:[#allocation5 + $0x48] sm:$0xff]  ;;  %v221_v53 = vld [vmem:[#allocation5 + $0x50] sm:$0xff]  ;;  %715 = vmatprep.mubr.bf16.mxu1 %v4950_v60  ;;  %v4951_v61 = vmov 1966171168  }
  0x4d   :  { %v219_v21 = vld [vmem:[#allocation5 + $0x40] sm:$0xff]  ;;  %v3849_v25 = vcombine.low %v212_v22, %v220_v24  ;;  %v3850_v26 = vcombine.high %v212_v22, %v220_v24  ;;  %v228_v30 = vld [vmem:[#allocation5 + $0x88] sm:$0xff]  ;;  %v214_v54 = vld [vmem:[#allocation5 + $0x18] sm:$0xff]  ;;  %v3852_v55 = vcombine.high %v213_v52, %v221_v53  ;;  %v3851_v57 = vcombine.low %v213_v52, %v221_v53 }
  0x4e   :  { %v3848_v23 = vcombine.high %v211_v20, %v219_v21  ;;  %v3847_v27 = vcombine.low %v211_v20, %v219_v21  ;;  %v227_v28 = vld [vmem:[#allocation5 + $0x80] sm:$0xff]  ;;  %v236_v32 = vld [vmem:[#allocation5 + $0xc8] sm:$0xff]  ;;  %v222_v56 = vld [vmem:[#allocation5 + $0x58] sm:$0xff]  ;;  %v184_v62 = vunpack.c.l.s4 %v4951_v61 }
  0x4f   :  { %4498 = vmatpush3.bf16.msra.mxu0 %v4544_v2  ;;  %v235_v29 = vld [vmem:[#allocation5 + $0xc0] sm:$0xff]  ;;  %v3865_v33 = vcombine.low %v228_v30, %v236_v32  ;;  %v3866_v34 = vcombine.high %v228_v30, %v236_v32  ;;  %v244_v38 = vld [vmem:[#allocation5 + $0x108] sm:$0xff]  ;;  %v3853_v58 = vcombine.low %v214_v54, %v222_v56  ;;  %v3854_v59 = vcombine.high %v214_v54, %v222_v56  ;;  %v238_v20 = vld [vmem:[#allocation5 + $0xd8] sm:$0xff] }
  0x50   :  { %4499 = vmatprep.subr.bf16.mxu0 %v4948_v0  ;;  %683 = vmatprep.subr.bf16.mxu1 %v3848_v23  ;;  %v3864_v31 = vcombine.high %v227_v28, %v235_v29  ;;  %v3863_v35 = vcombine.low %v227_v28, %v235_v29  ;;  %v243_v36 = vld [vmem:[#allocation5 + $0x100] sm:$0xff]  ;;  %v252_v40 = vld [vmem:[#allocation5 + $0x148] sm:$0xff]  ;;  %v185_v1 = vunpack.c.0.s8 %v184_v62  ;;  %v5080_v2 = vshrl.u32 %v186_v63, 7  ;;  %v245_v24 = vld [vmem:[#allocation5 + $0x110] sm:$0xff] }
  0x51   :  { %684 = vmatpush1.bf16.msra.mxu1 %v3847_v27  ;;  %v251_v37 = vld [vmem:[#allocation5 + $0x140] sm:$0xff]  ;;  %v3881_v41 = vcombine.low %v244_v38, %v252_v40  ;;  %v3882_v42 = vcombine.high %v244_v38, %v252_v40  ;;  %v260_v46 = vld [vmem:[#allocation5 + $0x188] sm:$0xff]  ;;  %v254_v27 = vld [vmem:[#allocation5 + $0x158] sm:$0xff] }
  0x52   :  { %685 = vmatprep.subr.bf16.mxu1 %v3864_v31  ;;  %v3880_v39 = vcombine.high %v243_v36, %v251_v37  ;;  %v3879_v43 = vcombine.low %v243_v36, %v251_v37  ;;  %v259_v44 = vld [vmem:[#allocation5 + $0x180] sm:$0xff]  ;;  %v268_v48 = vld [vmem:[#allocation5 + $0x1c8] sm:$0xff]  ;;  %v261_v31 = vld [vmem:[#allocation5 + $0x190] sm:$0xff] }
  0x53   :  { %4500 = vmatpush3.bf16.msra.mxu0 %v4545_v3  ;;  %v267_v45 = vld [vmem:[#allocation5 + $0x1c0] sm:$0xff]  ;;  %v3897_v49 = vcombine.low %v260_v46, %v268_v48  ;;  %v3898_v50 = vcombine.high %v260_v46, %v268_v48  ;;  %v269_v32 = vld [vmem:[#allocation5 + $0x1d0] sm:$0xff] }
  0x54   :  { %4501 = vmatprep.subr.bf16.mxu0 %v4948_v0  ;;  %v3896_v47 = vcombine.high %v259_v44, %v267_v45  ;;  %v3895_v51 = vcombine.low %v259_v44, %v267_v45  ;;  %v3900_v37 = vcombine.high %v261_v31, %v269_v32  ;;  %v223_v40 = vld [vmem:[#allocation5 + $0x60] sm:$0xff] }
  0x55   :  { %686 = vmatpush1.bf16.msra.mxu1 %v3863_v35  ;;  %v239_v48 = vld [vmem:[#allocation5 + $0xe0] sm:$0xff] }
  0x56   :  { %687 = vmatprep.subr.bf16.mxu1 %v3880_v39  ;;  %v215_v39 = vld [vmem:[#allocation5 + $0x20] sm:$0xff] }
  0x57   :  { %4502 = vmatpush3.bf16.msra.mxu0 %v4546_v4  ;;  %v3856_v45 = vcombine.high %v215_v39, %v223_v40  ;;  %v255_v56 = vld [vmem:[#allocation5 + $0x160] sm:$0xff] }
  0x58   :  { %724 = vmatprep.subr.bf16.mxu0 %v3850_v26  ;;  %v246_v26 = vld [vmem:[#allocation5 + $0x118] sm:$0xff] }
  0x59   :  { %688 = vmatpush1.bf16.msra.mxu1 %v3879_v43  ;;  %v3886_v30 = vcombine.high %v246_v26, %v254_v27  ;;  %v3885_v36 = vcombine.low %v246_v26, %v254_v27  ;;  %v3899_v43 = vcombine.low %v261_v31, %v269_v32  ;;  %v242_v26 = vld [vmem:[#allocation5 + $0xf8] sm:$0xff]  ;;  %v257_v31 = vld [vmem:[#allocation5 + $0x170] sm:$0xff] }
  0x5a   :  { %4504 = vmatmul.mubr.msk.bf16.vlgmr.msra.gmra.mrb[0].mxu0 %vm121_vm1, %v88_v6  ;;  %689 = vmatprep.subr.bf16.mxu1 %v3896_v47  ;;  %v231_v47 = vld [vmem:[#allocation5 + $0xa0] sm:$0xff]  ;;  %v250_v32 = vld [vmem:[#allocation5 + $0x138] sm:$0xff] }
  0x5b   :  { %725 = vmatpush1.bf16.msra.mxu0 %v3849_v25  ;;  %756 = vmatprep.mubr.bf16.mxu0 %v4950_v60  ;;  %v253_v25 = vld [vmem:[#allocation5 + $0x150] sm:$0xff]  ;;  %v3872_v53 = vcombine.high %v231_v47, %v239_v48 }
  0x5c   :  { %726 = vmatprep.subr.bf16.mxu0 %v3866_v34  ;;  %v3884_v29 = vcombine.high %v245_v24, %v253_v25  ;;  %v270_v34 = vld [vmem:[#allocation5 + $0x1d8] sm:$0xff]  ;;  %v3883_v35 = vcombine.low %v245_v24, %v253_v25  ;;  %v241_v24 = vld [vmem:[#allocation5 + $0xf0] sm:$0xff] }
  0x5d   :  { %690 = vmatpush1.bf16.msra.mxu1 %v3895_v51  ;;  %v3855_v51 = vcombine.low %v215_v39, %v223_v40  ;;  %v234_v25 = vld [vmem:[#allocation5 + $0xb8] sm:$0xff]  ;;  %v273_v39 = vld [vmem:[#allocation5 + $0x1f0] sm:$0xff] }
  0x5e   :  { %765 = vmatprep.subr.bf16.mxu1 %v3852_v55  ;;  %v247_v55 = vld [vmem:[#allocation5 + $0x120] sm:$0xff]  ;;  %v266_v40 = vld [vmem:[#allocation5 + $0x1b8] sm:$0xff] }
  0x5f   :  { %727 = vmatpush1.bf16.msra.mxu0 %v3865_v33  ;;  %v262_v33 = vld [vmem:[#allocation5 + $0x198] sm:$0xff]  ;;  %v3888_v62 = vcombine.high %v247_v55, %v255_v56 }
  0x60   :  { %728 = vmatprep.subr.bf16.mxu0 %v3882_v42  ;;  %v3902_v38 = vcombine.high %v262_v33, %v270_v34  ;;  %v224_v42 = vld [vmem:[#allocation5 + $0x68] sm:$0xff]  ;;  %v3901_v44 = vcombine.low %v262_v33, %v270_v34  ;;  %v258_v33 = vld [vmem:[#allocation5 + $0x178] sm:$0xff] }
  0x63   :  { %729 = vmatpush1.bf16.msra.mxu0 %v3881_v41  ;;  %v216_v41 = vld [vmem:[#allocation5 + $0x28] sm:$0xff] }
  0x64   :  { %730 = vmatprep.subr.bf16.mxu0 %v3898_v50  ;;  %v3858_v46 = vcombine.high %v216_v41, %v224_v42  ;;  %v240_v50 = vld [vmem:[#allocation5 + $0xe8] sm:$0xff]  ;;  %v3857_v52 = vcombine.low %v216_v41, %v224_v42  ;;  %v274_v41 = vld [vmem:[#allocation5 + $0x1f8] sm:$0xff] }
  0x67   :  { %731 = vmatpush1.bf16.msra.mxu0 %v3897_v49  ;;  %v232_v49 = vld [vmem:[#allocation5 + $0xa8] sm:$0xff] }
  0x68   :  { %806 = vmatprep.subr.bf16.mxu0 %v3854_v59  ;;  %v3874_v54 = vcombine.high %v232_v49, %v240_v50  ;;  %v3871_v59 = vcombine.low %v231_v47, %v239_v48  ;;  %v3873_v61 = vcombine.low %v232_v49, %v240_v50  ;;  %v3909_v47 = vcombine.low %v266_v40, %v274_v41  ;;  %v4548_v48 = vld [vmem:[#allocation7 + $0x40] sm:$0xff]  }
  0x69   :  { %v4549_v49 = vld [vmem:[#allocation7 + $0xc0] sm:$0xff]  }
  0x6a   :  { %v4550_v50 = vld [vmem:[#allocation7] sm:$0xff]  }
 0x12d   :  { %v159_v8 = vpop.f32.mrb[0].mxu0 }
 0x12e   :  { %v165_v9 = vadd.f32 %v159_v8, %v5069_v7  ;;  %v4505_v10 = vpop.f32.mrb[1].mxu0 }
 0x12f   :  { %v162_v11 = vpop.f32.mrb[2].mxu0 }
 0x130   :  { %v4506_v12 = vpop.f32.mrb[3].mxu0  ;;  %v166_v13 = vadd.f32 %v165_v9, %v86_v5  ;;  %v5083_v5 = vsub.s32 %v185_v1, %v5080_v2  ;;  %v263_v1 = vld [vmem:[#allocation5 + $0x1a0] sm:$0xff] }
 0x132   :  { %v168_v14 = vsel %vm167_vm2, %v166_v13, 0.0  ;;  %v189_v8 = vrot.slane %v5069_v7, %v5083_v5 }
 0x133   :  { %169 = vadd.xlane.f32.xlu0 %v168_v14 }
 0x134   :  { %v190_v9 = vcombine.high %v189_v8, %v189_v8  ;;  %v197_v10 = vrot.slane %v189_v8, %v5083_v5  ;;  %v3887_v8 = vcombine.low %v247_v55, %v255_v56  ;;  %v4555_v55 = vld [vmem:[#allocation7 + $0x88] sm:$0xff]   ;;  %v4556_v56 = vld [vmem:[#allocation7 + $0x50] sm:$0xff]  }
 0x136   :  { %v5089_v11 = vrot.slane %v190_v9, %v5083_v5 }
 0x1c0   :  { %v170_v15 = vpop.xlane.xlu0 %169 }
 0x1c1   :  { %v172_v16 = vmul.f32 0.015625, %v170_v15 }
 0x1c3   :  { %v5073_v17 = vsub.f32 %v166_v13, %v172_v16  ;;  %v207_v13 = vcombine.high %v197_v10, %v197_v10  ;;  %v229_v16 = vld [vmem:[#allocation5 + $0x90] sm:$0xff] }
 0x1c5   :  { %v174_v18 = vmul.f32 %v5073_v17, %v5073_v17 }
 0x1c7   :  { %v175_v19 = vsel %vm167_vm2, %v174_v18, 0.0  ;;  %v237_v18 = vld [vmem:[#allocation5 + $0xd0] sm:$0xff] }
 0x1c8   :  { %176 = vadd.xlane.f32.xlu0 %v175_v19  ;;  %v230_v19 = vld [vmem:[#allocation5 + $0x98] sm:$0xff]  ;;  %v3868_v22 = vcombine.high %v229_v16, %v237_v18 }
 0x1c9   :  { %v3870_v23 = vcombine.high %v230_v19, %v238_v20  ;;  %v3869_v28 = vcombine.low %v230_v19, %v238_v20 }
 0x255   :  { %v177_v3 = vpop.xlane.xlu0 %176 }
 0x256   :  { %v178_v4 = vmul.f32 0.015625, %v177_v3  ;;  %v271_v3 = vld [vmem:[#allocation5 + $0x1e0] sm:$0xff] }
 0x257   :  { %v3904_v10 = vcombine.high %v263_v1, %v271_v3 }
 0x258   :  { %v179_v6 = vadd.f32 1e-05, %v178_v4  ;;  %v264_v4 = vld [vmem:[#allocation5 + $0x1a8] sm:$0xff] }
 0x25a   :  { %4681 = vrsqrt.f32 %v179_v6  ;;  %v272_v6 = vld [vmem:[#allocation5 + $0x1e8] sm:$0xff] }
 0x25b   :  { %v3905_v19 = vcombine.low %v264_v4, %v272_v6 }
 0x264   :  { %v4682_v12 = vpop.eup %4681 }
 0x265   :  { %v181_v14 = vmul.f32 %v4682_v12, %v5073_v17  ;;  %v3867_v17 = vcombine.low %v229_v16, %v237_v18  ;;  %v3906_v12 = vcombine.high %v264_v4, %v272_v6  ;;  %v226_v16 = vld [vmem:[#allocation5 + $0x78] sm:$0xff]  ;;  %v3903_v18 = vcombine.low %v263_v1, %v271_v3  ;;  %v4564_v1 = vld [vmem:[#allocation7 + $0x60] sm:$0xff]  }
 0x266   :  { %v4565_v3 = vld [vmem:[#allocation7 + $0xe0] sm:$0xff]  }
 0x267   :  { %v206_v15 = vmul.f32 %v5089_v11, %v181_v14  ;;  %v225_v14 = vld [vmem:[#allocation5 + $0x70] sm:$0xff]  ;;  %v4566_v4 = vld [vmem:[#allocation7 + $0x20] sm:$0xff]  }
 0x268   :  { %v4567_v6 = vld [vmem:[#allocation7 + $0xa0] sm:$0xff]  }
 0x269   :  { %v5093_v21 = vadd.f32 %v207_v13, %v206_v15  ;;  %v217_v13 = vld [vmem:[#allocation5 + $0x30] sm:$0xff]  ;;  %v218_v15 = vld [vmem:[#allocation5 + $0x38] sm:$0xff] }
 0x26a   :  { %v3860_v20 = vcombine.high %v217_v13, %v225_v14  ;;  %v3859_v27 = vcombine.low %v217_v13, %v225_v14  ;;  %v4572_v13 = vld [vmem:[#allocation7 + $0x70] sm:$0xff]  }
 0x26b   :  { %v5097_v7 = vpack.c.bf16 %v5093_v21, %v5093_v21  ;;  %v4573_v14 = vld [vmem:[#allocation7 + $0xf0] sm:$0xff]  }
 0x26d   :  { %3911 = vmatmul.mubr.msk.bf16.vlgmr.msra.gmra.mrb[0].mxu1 %vm121_vm1, %v5097_v7  ;;  %3912 = vmatmul.mubr.msk.bf16.vlgmr.msra.gmra.mrb[4].mxu0 %vm121_vm1, %v5097_v7 }
 0x26e   :  { %766 = vmatpush1.bf16.msra.mxu1 %v3851_v57  ;;  %807 = vmatpush1.bf16.msra.mxu0 %v3853_v58  ;;  %v248_v57 = vld [vmem:[#allocation5 + $0x128] sm:$0xff] }
 0x26f   :  { %767 = vmatprep.subr.bf16.mxu1 %v3868_v22  ;;  %808 = vmatprep.subr.bf16.mxu0 %v3870_v23  ;;  %v256_v58 = vld [vmem:[#allocation5 + $0x168] sm:$0xff]  ;;  %v3862_v22 = vcombine.high %v218_v15, %v226_v16  ;;  %v233_v23 = vld [vmem:[#allocation5 + $0xb0] sm:$0xff] }
 0x270   :  { %797 = vmatprep.mubr.bf16.mxu1 %v4950_v60  ;;  %838 = vmatprep.mubr.bf16.mxu0 %v4950_v60  ;;  %v3890_v63 = vcombine.high %v248_v57, %v256_v58  ;;  %v3889_v9 = vcombine.low %v248_v57, %v256_v58  ;;  %v3875_v34 = vcombine.low %v233_v23, %v241_v24  ;;  %v4557_v57 = vld [vmem:[#allocation7 + $0xd0] sm:$0xff]  }
 0x271   :  { %v4558_v58 = vld [vmem:[#allocation7 + $0x10] sm:$0xff]  }
 0x272   :  { %768 = vmatpush1.bf16.msra.mxu1 %v3867_v17  ;;  %809 = vmatpush1.bf16.msra.mxu0 %v3869_v28  ;;  %v3861_v17 = vcombine.low %v218_v15, %v226_v16  ;;  %v3876_v28 = vcombine.high %v233_v23, %v241_v24  ;;  %v4574_v15 = vld [vmem:[#allocation7 + $0x30] sm:$0xff]   ;;  %v4580_v23 = vld [vmem:[#allocation7 + $0x140] sm:$0xff]  }
 0x273   :  { %769 = vmatprep.subr.bf16.mxu1 %v3884_v29  ;;  %810 = vmatprep.subr.bf16.mxu0 %v3886_v30  ;;  %v3878_v29 = vcombine.high %v234_v25, %v242_v26  ;;  %v249_v30 = vld [vmem:[#allocation5 + $0x130] sm:$0xff]  ;;  %v4581_v24 = vld [vmem:[#allocation7 + $0x1c0] sm:$0xff]  }
 0x274   :  { %v3891_v42 = vcombine.low %v249_v30, %v257_v31  ;;  %v4575_v16 = vld [vmem:[#allocation7 + $0xb0] sm:$0xff]  }
 0x276   :  { %770 = vmatpush1.bf16.msra.mxu1 %v3883_v35  ;;  %811 = vmatpush1.bf16.msra.mxu0 %v3885_v36  ;;  %v3877_v35 = vcombine.low %v234_v25, %v242_v26  ;;  %v3892_v36 = vcombine.high %v249_v30, %v257_v31  ;;  %v5122_v25 = vsub.s32 0, %v5080_v2  ;;  %v5125_v26 = vsub.s32 2, %v5080_v2 }
 0x277   :  { %771 = vmatprep.subr.bf16.mxu1 %v3900_v37  ;;  %812 = vmatprep.subr.bf16.mxu0 %v3902_v38  ;;  %v3894_v37 = vcombine.high %v250_v32, %v258_v33  ;;  %v265_v38 = vld [vmem:[#allocation5 + $0x1b0] sm:$0xff] }
 0x27a   :  { %772 = vmatpush1.bf16.msra.mxu1 %v3899_v43  ;;  %813 = vmatpush1.bf16.msra.mxu0 %v3901_v44  ;;  %v3893_v43 = vcombine.low %v250_v32, %v258_v33  ;;  %v3908_v44 = vcombine.high %v265_v38, %v273_v39 }
 0x27b   :  { %847 = vmatprep.subr.bf16.mxu1 %v3856_v45  ;;  %888 = vmatprep.subr.bf16.mxu0 %v3858_v46  ;;  %v3910_v45 = vcombine.high %v266_v40, %v274_v41  ;;  %v3907_v46 = vcombine.low %v265_v38, %v273_v39 }
 0x27d   :  { %3913 = vmatmul.mubr.msk.bf16.vlgmr.msra.gmra.mrb[4].mxu1 %vm121_vm1, %v5097_v7  ;;  %3914 = vmatmul.mubr.msk.bf16.vlgmr.msra.gmra.mrb[8].mxu0 %vm121_vm1, %v5097_v7 }
 0x27e   :  { %848 = vmatpush1.bf16.msra.mxu1 %v3855_v51  ;;  %889 = vmatpush1.bf16.msra.mxu0 %v3857_v52  ;;  %v4551_v51 = vld [vmem:[#allocation7 + $0x80] sm:$0xff]   ;;  %v4552_v52 = vld [vmem:[#allocation7 + $0x48] sm:$0xff]  }
 0x27f   :  { %849 = vmatprep.subr.bf16.mxu1 %v3872_v53  ;;  %890 = vmatprep.subr.bf16.mxu0 %v3874_v54  ;;  %v4553_v53 = vld [vmem:[#allocation7 + $0xc8] sm:$0xff]  }
 0x280   :  { %879 = vmatprep.mubr.bf16.mxu1 %v4950_v60  ;;  %920 = vmatprep.mubr.bf16.mxu0 %v4950_v60  ;;  %v4554_v54 = vld [vmem:[#allocation7 + $0x8] sm:$0xff]  }
 0x282   :  { %850 = vmatpush1.bf16.msra.mxu1 %v3871_v59  ;;  %891 = vmatpush1.bf16.msra.mxu0 %v3873_v61  ;;  %v4559_v59 = vld [vmem:[#allocation7 + $0x90] sm:$0xff]   ;;  %v4560_v61 = vld [vmem:[#allocation7 + $0x58] sm:$0xff]  }
 0x283   :  { %851 = vmatprep.subr.bf16.mxu1 %v3888_v62  ;;  %892 = vmatprep.subr.bf16.mxu0 %v3890_v63  ;;  %v4561_v62 = vld [vmem:[#allocation7 + $0xd8] sm:$0xff]  }
 0x284   :  { %v4562_v63 = vld [vmem:[#allocation7 + $0x18] sm:$0xff]  }
 0x286   :  { %852 = vmatpush1.bf16.msra.mxu1 %v3887_v8  ;;  %893 = vmatpush1.bf16.msra.mxu0 %v3889_v9  ;;  %v4568_v8 = vld [vmem:[#allocation7 + $0x68] sm:$0xff]  }
 0x287   :  { %853 = vmatprep.subr.bf16.mxu1 %v3904_v10  ;;  %894 = vmatprep.subr.bf16.mxu0 %v3906_v12  ;;  %v4569_v9 = vld [vmem:[#allocation7 + $0xe8] sm:$0xff]  }
 0x288   :  { %v4570_v10 = vld [vmem:[#allocation7 + $0x28] sm:$0xff]  }
 0x289   :  { %v4571_v12 = vld [vmem:[#allocation7 + $0xa8] sm:$0xff]  }
 0x28a   :  { %854 = vmatpush1.bf16.msra.mxu1 %v3903_v18  ;;  %895 = vmatpush1.bf16.msra.mxu0 %v3905_v19  ;;  %v4576_v18 = vld [vmem:[#allocation7 + $0x78] sm:$0xff]  }
 0x28b   :  { %929 = vmatprep.subr.bf16.mxu1 %v3860_v20  ;;  %970 = vmatprep.subr.bf16.mxu0 %v3862_v22  ;;  %v4577_v19 = vld [vmem:[#allocation7 + $0xf8] sm:$0xff]  }
 0x28c   :  { %v4578_v20 = vld [vmem:[#allocation7 + $0x38] sm:$0xff]  }
 0x28d   :  { %3915 = vmatmul.mubr.msk.bf16.vlgmr.msra.gmra.mrb[8].mxu1 %vm121_vm1, %v5097_v7  ;;  %3916 = vmatmul.mubr.msk.bf16.vlgmr.msra.gmra.mrb[12].mxu0 %vm121_vm1, %v5097_v7  ;;  %v4579_v22 = vld [vmem:[#allocation7 + $0xb8] sm:$0xff]  }
 0x28e   :  { %930 = vmatpush1.bf16.msra.mxu1 %v3859_v27  ;;  %971 = vmatpush1.bf16.msra.mxu0 %v3861_v17  ;;  %v5130_v27 = vld [vmem:[%s5366_s4] ss:$2 sm:$0xff]  ;;  %v5133_v17 = vsub.s32 1, %v5080_v2 }
 0x28f   :  { %931 = vmatprep.subr.bf16.mxu1 %v3876_v28  ;;  %972 = vmatprep.subr.bf16.mxu0 %v3878_v29  ;;  %v5136_v28 = vsub.s32 3, %v5080_v2  ;;  %v603_v29 = vrot.slane %v5130_v27, %v5122_v25  ;;  %v611_v30 = vrot.slane %v5130_v27, %v5125_v26 }
 0x290   :  { %961 = vmatprep.mubr.bf16.mxu1 %v4950_v60  ;;  %1002 = vmatprep.mubr.bf16.mxu0 %v4950_v60  ;;  %v607_v31 = vrot.slane %v5130_v27, %v5133_v17 }
 0x291   :  { %v615_v32 = vrot.slane %v5130_v27, %v5136_v28 }
 0x292   :  { %932 = vmatpush1.bf16.msra.mxu1 %v3875_v34  ;;  %973 = vmatpush1.bf16.msra.mxu0 %v3877_v35 }
 0x293   :  { %933 = vmatprep.subr.bf16.mxu1 %v3892_v36  ;;  %974 = vmatprep.subr.bf16.mxu0 %v3894_v37 }
 0x296   :  { %934 = vmatpush1.bf16.msra.mxu1 %v3891_v42  ;;  %975 = vmatpush1.bf16.msra.mxu0 %v3893_v43 }
 0x297   :  { %935 = vmatprep.subr.bf16.mxu1 %v3908_v44  ;;  %976 = vmatprep.subr.bf16.mxu0 %v3910_v45 }
 0x29a   :  { %936 = vmatpush1.bf16.msra.mxu1 %v3907_v46  ;;  %977 = vmatpush1.bf16.msra.mxu0 %v3909_v47 }
 0x29b   :  { %4133 = vmatprep.subr.bf16.mxu1 %v4548_v48  ;;  %4155 = vmatprep.subr.bf16.mxu0 %v4549_v49 }
 0x29d   :  { %3917 = vmatmul.mubr.msk.bf16.vlgmr.msra.gmra.mrb[12].mxu1 %vm121_vm1, %v5097_v7  ;;  %3918 = vmatmul.mubr.msk.bf16.vlgmr.msra.gmra.mrb[16].mxu0 %vm121_vm1, %v5097_v7  ;;  %v4563_v7 = vld [vmem:[#allocation7 + $0x98] sm:$0xff]  }
 0x29e   :  { %4134 = vmatpush3.bf16.msra.mxu1 %v4550_v50  ;;  %4156 = vmatpush3.bf16.msra.mxu0 %v4551_v51  ;;  %v4582_v51 = vld [vmem:[#allocation7 + $0x100] sm:$0xff]  }
 0x29f   :  { %4135 = vmatprep.subr.bf16.mxu1 %v4552_v52  ;;  %4157 = vmatprep.subr.bf16.mxu0 %v4553_v53  ;;  %v4583_v52 = vld [vmem:[#allocation7 + $0x180] sm:$0xff]  }
 0x2a2   :  { %4136 = vmatpush3.bf16.msra.mxu1 %v4554_v54  ;;  %4158 = vmatpush3.bf16.msra.mxu0 %v4555_v55  ;;  %v4584_v55 = vld [vmem:[#allocation7 + $0x148] sm:$0xff]  }
 0x2a3   :  { %4137 = vmatprep.subr.bf16.mxu1 %v4556_v56  ;;  %4159 = vmatprep.subr.bf16.mxu0 %v4557_v57  ;;  %v4585_v56 = vld [vmem:[#allocation7 + $0x1c8] sm:$0xff]  }
 0x2a4   :  { %v4586_v57 = vld [vmem:[#allocation7 + $0x108] sm:$0xff]  }
 0x2a6   :  { %4138 = vmatpush3.bf16.msra.mxu1 %v4558_v58  ;;  %4160 = vmatpush3.bf16.msra.mxu0 %v4559_v59  ;;  %v4587_v58 = vld [vmem:[#allocation7 + $0x188] sm:$0xff]   ;;  %v5147_v59 = vsub.s32 5, %v5080_v2 }
 0x2a7   :  { %4139 = vmatprep.subr.bf16.mxu1 %v4560_v61  ;;  %4161 = vmatprep.subr.bf16.mxu0 %v4561_v62  ;;  %v5150_v61 = vsub.s32 7, %v5080_v2  ;;  %v4588_v62 = vld [vmem:[#allocation7 + $0x150] sm:$0xff]  }
 0x2aa   :  { %4140 = vmatpush3.bf16.msra.mxu1 %v4562_v63  ;;  %4162 = vmatpush3.bf16.msra.mxu0 %v4563_v7  ;;  %v4589_v63 = vld [vmem:[#allocation7 + $0x1d0] sm:$0xff]   ;;  %v623_v7 = vrot.slane %v5130_v27, %v5147_v59 }
 0x2ab   :  { %4141 = vmatprep.subr.bf16.mxu1 %v4564_v1  ;;  %4163 = vmatprep.subr.bf16.mxu0 %v4565_v3  ;;  %v631_v1 = vrot.slane %v5130_v27, %v5150_v61  ;;  %v4590_v3 = vld [vmem:[#allocation7 + $0x110] sm:$0xff]  }
 0x2ae   :  { %4142 = vmatpush3.bf16.msra.mxu1 %v4566_v4  ;;  %4164 = vmatpush3.bf16.msra.mxu0 %v4567_v6  ;;  %v4591_v4 = vld [vmem:[#allocation7 + $0x190] sm:$0xff]   ;;  %v4592_v6 = vld [vmem:[#allocation7 + $0x158] sm:$0xff]  }
 0x2af   :  { %4143 = vmatprep.subr.bf16.mxu1 %v4568_v8  ;;  %4165 = vmatprep.subr.bf16.mxu0 %v4569_v9  ;;  %v4593_v8 = vld [vmem:[#allocation7 + $0x1d8] sm:$0xff]  }
 0x2b2   :  { %4144 = vmatpush3.bf16.msra.mxu1 %v4570_v10  ;;  %4166 = vmatpush3.bf16.msra.mxu0 %v4571_v12 }
 0x2b3   :  { %4145 = vmatprep.subr.bf16.mxu1 %v4572_v13  ;;  %4167 = vmatprep.subr.bf16.mxu0 %v4573_v14 }
 0x2b6   :  { %4146 = vmatpush3.bf16.msra.mxu1 %v4574_v15  ;;  %4168 = vmatpush3.bf16.msra.mxu0 %v4575_v16 }
 0x2b7   :  { %4147 = vmatprep.subr.bf16.mxu1 %v4576_v18  ;;  %4169 = vmatprep.subr.bf16.mxu0 %v4577_v19  ;;  %v4594_v19 = vld [vmem:[#allocation7 + $0x118] sm:$0xff]  }
 0x2ba   :  { %4148 = vmatpush3.bf16.msra.mxu1 %v4578_v20  ;;  %4170 = vmatpush3.bf16.msra.mxu0 %v4579_v22  ;;  %v4595_v20 = vld [vmem:[#allocation7 + $0x198] sm:$0xff]  }
 0x2bb   :  { %4177 = vmatprep.subr.bf16.mxu1 %v4580_v23  ;;  %4199 = vmatprep.subr.bf16.mxu0 %v4581_v24  ;;  %v4596_v24 = vld [vmem:[#allocation7 + $0x160] sm:$0xff]  }
 0x340   :  { %v717_v33 = vpop.f32.mrb[0].mxu1  ;;  %v758_v34 = vpop.f32.mrb[4].mxu0 }
 0x341   :  { %v718_v35 = vadd.f32 %v717_v33, %v603_v29  ;;  %v759_v36 = vadd.f32 %v758_v34, %v611_v30  ;;  %v719_v37 = vpop.f32.mrb[1].mxu1  ;;  %v760_v38 = vpop.f32.mrb[5].mxu0  ;;  %v4597_v29 = vld [vmem:[#allocation7 + $0x1e0] sm:$0xff]  }
 0x342   :  { %v720_v39 = vadd.f32 %v719_v37, %v607_v31  ;;  %v761_v40 = vadd.f32 %v760_v38, %v615_v32  ;;  %v721_v41 = vpop.f32.mrb[2].mxu1  ;;  %v762_v42 = vpop.f32.mrb[6].mxu0  ;;  %v4598_v34 = vld [vmem:[#allocation7 + $0x120] sm:$0xff]   ;;  %v5160_v37 = vsub.s32 6, %v5080_v2  ;;  %v4600_v38 = vld [vmem:[#allocation7 + $0x168] sm:$0xff]  }
 0x343   :  { %v1011_v43 = vmax.f32 %v718_v35, 0.0  ;;  %v1013_v44 = vmax.f32 %v759_v36, 0.0  ;;  %v722_v45 = vpop.f32.mrb[3].mxu1  ;;  %v763_v46 = vpop.f32.mrb[7].mxu0  ;;  %v4599_v35 = vld [vmem:[#allocation7 + $0x1a0] sm:$0xff]   ;;  %v5157_v36 = vsub.s32 4, %v5080_v2 }
 0x344   :  { %v1012_v47 = vmax.f32 %v720_v39, 0.0  ;;  %v1014_v48 = vmax.f32 %v761_v40, 0.0  ;;  %v4601_v39 = vld [vmem:[#allocation7 + $0x1e8] sm:$0xff]   ;;  %v5169_v2 = vld [vmem:[%s5366_s4 + $0x10] ss:$2 sm:$0xff] }
 0x345   :  { %v1027_v53 = vpack.c.bf16 %v1011_v43, %v1011_v43  ;;  %v1029_v54 = vpack.c.bf16 %v1013_v44, %v1013_v44  ;;  %v4602_v40 = vld [vmem:[#allocation7 + $0x128] sm:$0xff]   ;;  %v619_v42 = vrot.slane %v5130_v27, %v5157_v36  ;;  %v627_v43 = vrot.slane %v5130_v27, %v5160_v37  ;;  %v4604_v44 = vld [vmem:[#allocation7 + $0x170] sm:$0xff]  }
 0x346   :  { %v1028_v49 = vpack.c.bf16 %v1012_v47, %v1012_v47  ;;  %v1030_v50 = vpack.c.bf16 %v1014_v48, %v1014_v48  ;;  %v4603_v41 = vld [vmem:[#allocation7 + $0x1a8] sm:$0xff]   ;;  %v4605_v45 = vld [vmem:[#allocation7 + $0x1f0] sm:$0xff]   ;;  %v639_v46 = vrot.slane %v5169_v2, %v5133_v17  ;;  %v647_v47 = vrot.slane %v5169_v2, %v5136_v28 }
 0x347   :  { %v4606_v48 = vld [vmem:[#allocation7 + $0x130] sm:$0xff]  }
 0x348   :  { %2099 = vmatprep.mubr.bf16.mxu1 %v1028_v49  ;;  %2139 = vmatprep.mubr.bf16.mxu0 %v1030_v50  ;;  %v4607_v49 = vld [vmem:[#allocation7 + $0x1b0] sm:$0xff]  }
 0x349   :  { %2100 = vmatmul.mubr.bf16.vlgmr.msra.gmra.mrb[16].mxu1 %v1027_v53  ;;  %2140 = vmatmul.mubr.bf16.vlgmr.msra.gmra.mrb[20].mxu0 %v1029_v54 }
 0x34a   :  { %4178 = vmatpush3.bf16.msra.mxu1 %v4582_v51  ;;  %4200 = vmatpush3.bf16.msra.mxu0 %v4583_v52  ;;  %v4608_v51 = vld [vmem:[#allocation7 + $0x178] sm:$0xff]  }
 0x34b   :  { %4179 = vmatprep.subr.bf16.mxu1 %v4584_v55  ;;  %4201 = vmatprep.subr.bf16.mxu0 %v4585_v56  ;;  %v4609_v52 = vld [vmem:[#allocation7 + $0x1f8] sm:$0xff]  }
 0x34e   :  { %4180 = vmatpush3.bf16.msra.mxu1 %v4586_v57  ;;  %4202 = vmatpush3.bf16.msra.mxu0 %v4587_v58 }
 0x34f   :  { %4181 = vmatprep.subr.bf16.mxu1 %v4588_v62  ;;  %4203 = vmatprep.subr.bf16.mxu0 %v4589_v63 }
 0x350   :  { %v799_v9 = vpop.f32.mrb[4].mxu1  ;;  %v840_v10 = vpop.f32.mrb[8].mxu0 }
 0x351   :  { %v801_v12 = vpop.f32.mrb[5].mxu1  ;;  %v842_v13 = vpop.f32.mrb[9].mxu0  ;;  %v800_v27 = vadd.f32 %v799_v9, %v619_v42  ;;  %v841_v50 = vadd.f32 %v840_v10, %v627_v43  ;;  %v4612_v9 = vld [vmem:[#allocation7 + $0x240] sm:$0xff]  }
 0x352   :  { %v802_v14 = vadd.f32 %v801_v12, %v623_v7  ;;  %v843_v15 = vadd.f32 %v842_v13, %v631_v1  ;;  %v803_v16 = vpop.f32.mrb[6].mxu1  ;;  %v844_v18 = vpop.f32.mrb[10].mxu0  ;;  %4182 = vmatpush3.bf16.msra.mxu1 %v4590_v3  ;;  %4204 = vmatpush3.bf16.msra.mxu0 %v4591_v4  ;;  %v4610_v7 = vld [vmem:[#allocation7 + $0x138] sm:$0xff]   ;;  %v4613_v10 = vld [vmem:[#allocation7 + $0x2c0] sm:$0xff]  }
 0x353   :  { %v804_v22 = vpop.f32.mrb[7].mxu1  ;;  %v845_v23 = vpop.f32.mrb[11].mxu0  ;;  %4183 = vmatprep.subr.bf16.mxu1 %v4592_v6  ;;  %4205 = vmatprep.subr.bf16.mxu0 %v4593_v8  ;;  %v4611_v1 = vld [vmem:[#allocation7 + $0x1b8] sm:$0xff]   ;;  %v1015_v3 = vmax.f32 %v800_v27, 0.0  ;;  %v1017_v4 = vmax.f32 %v841_v50, 0.0  ;;  %v4615_v18 = vld [vmem:[#allocation7 + $0x280] sm:$0xff]  }
 0x354   :  { %v1016_v30 = vmax.f32 %v802_v14, 0.0  ;;  %v1018_v31 = vmax.f32 %v843_v15, 0.0  ;;  %v4614_v14 = vld [vmem:[#allocation7 + $0x200] sm:$0xff]   ;;  %v4617_v22 = vld [vmem:[#allocation7 + $0x2c8] sm:$0xff]  }
 0x355   :  { %v1031_v15 = vpack.c.bf16 %v1015_v3, %v1015_v3  ;;  %v1033_v16 = vpack.c.bf16 %v1017_v4, %v1017_v4  ;;  %v4628_v27 = vld [vmem:[#allocation7 + $0x260] sm:$0xff]   ;;  %v655_v3 = vrot.slane %v5169_v2, %v5147_v59  ;;  %v663_v4 = vrot.slane %v5169_v2, %v5150_v61 }
 0x356   :  { %v1032_v32 = vpack.c.bf16 %v1016_v30, %v1016_v30  ;;  %v1034_v33 = vpack.c.bf16 %v1018_v31, %v1018_v31  ;;  %4184 = vmatpush3.bf16.msra.mxu1 %v4594_v19  ;;  %4206 = vmatpush3.bf16.msra.mxu0 %v4595_v20  ;;  %v4616_v20 = vld [vmem:[#allocation7 + $0x248] sm:$0xff]   ;;  %v4620_v30 = vld [vmem:[#allocation7 + $0x250] sm:$0xff]   ;;  %v4629_v50 = vld [vmem:[#allocation7 + $0x2e0] sm:$0xff]  }
 0x357   :  { %4185 = vmatprep.subr.bf16.mxu1 %v4596_v24  ;;  %4207 = vmatprep.subr.bf16.mxu0 %v4597_v29  ;;  %v4618_v24 = vld [vmem:[#allocation7 + $0x208] sm:$0xff]   ;;  %v4621_v31 = vld [vmem:[#allocation7 + $0x2d0] sm:$0xff]  }
 0x358   :  { %2179 = vmatprep.mubr.bf16.mxu1 %v1032_v32  ;;  %2219 = vmatprep.mubr.bf16.mxu0 %v1034_v33  ;;  %v4619_v29 = vld [vmem:[#allocation7 + $0x288] sm:$0xff]   ;;  %v659_v32 = vrot.slane %v5169_v2, %v5160_v37  ;;  %v4622_v33 = vld [vmem:[#allocation7 + $0x210] sm:$0xff]  }
 0x35a   :  { %4186 = vmatpush3.bf16.msra.mxu1 %v4598_v34  ;;  %4208 = vmatpush3.bf16.msra.mxu0 %v4599_v35  ;;  %v4623_v34 = vld [vmem:[#allocation7 + $0x290] sm:$0xff]   ;;  %v4624_v35 = vld [vmem:[#allocation7 + $0x258] sm:$0xff]  }
 0x35b   :  { %4187 = vmatprep.subr.bf16.mxu1 %v4600_v38  ;;  %4209 = vmatprep.subr.bf16.mxu0 %v4601_v39 }
 0x35e   :  { %4188 = vmatpush3.bf16.msra.mxu1 %v4602_v40  ;;  %4210 = vmatpush3.bf16.msra.mxu0 %v4603_v41  ;;  %v4625_v40 = vld [vmem:[#allocation7 + $0x2d8] sm:$0xff]  }
 0x35f   :  { %4189 = vmatprep.subr.bf16.mxu1 %v4604_v44  ;;  %4211 = vmatprep.subr.bf16.mxu0 %v4605_v45 }
 0x360   :  { %v5175_v53 = vpop.f32.mrb[8].mxu1  ;;  %v5177_v54 = vpop.f32.mrb[12].mxu0 }
 0x361   :  { %v883_v55 = vpop.f32.mrb[9].mxu1  ;;  %v924_v56 = vpop.f32.mrb[13].mxu0 }
 0x362   :  { %v884_v57 = vadd.f32 %v883_v55, %v639_v46  ;;  %v925_v58 = vadd.f32 %v924_v56, %v647_v47  ;;  %v885_v62 = vpop.f32.mrb[10].mxu1  ;;  %v926_v63 = vpop.f32.mrb[14].mxu0  ;;  %4190 = vmatpush3.bf16.msra.mxu1 %v4606_v48  ;;  %4212 = vmatpush3.bf16.msra.mxu0 %v4607_v49  ;;  %v4626_v46 = vld [vmem:[#allocation7 + $0x218] sm:$0xff]   ;;  %v4632_v55 = vld [vmem:[#allocation7 + $0x268] sm:$0xff]  }
 0x363   :  { %v886_v6 = vpop.f32.mrb[11].mxu1  ;;  %v927_v8 = vpop.f32.mrb[15].mxu0  ;;  %4191 = vmatprep.subr.bf16.mxu1 %v4608_v51  ;;  %4213 = vmatprep.subr.bf16.mxu0 %v4609_v52  ;;  %v4627_v49 = vld [vmem:[#allocation7 + $0x298] sm:$0xff]   ;;  %v4630_v51 = vld [vmem:[#allocation7 + $0x220] sm:$0xff]   ;;  %v4633_v56 = vld [vmem:[#allocation7 + $0x2e8] sm:$0xff]  }
 0x364   :  { %v1020_v12 = vmax.f32 %v884_v57, 0.0  ;;  %v1022_v13 = vmax.f32 %v925_v58, 0.0  ;;  %v4631_v52 = vld [vmem:[#allocation7 + $0x2a0] sm:$0xff]   ;;  %v4634_v57 = vld [vmem:[#allocation7 + $0x228] sm:$0xff]   ;;  %v635_v58 = vrot.slane %v5169_v2, %v5122_v25  ;;  %v4636_v63 = vld [vmem:[#allocation7 + $0x270] sm:$0xff]  }
 0x365   :  { %v4635_v62 = vld [vmem:[#allocation7 + $0x2a8] sm:$0xff]   ;;  %v4638_v6 = vld [vmem:[#allocation7 + $0x230] sm:$0xff]  }
 0x366   :  { %4192 = vmatpush3.bf16.msra.mxu1 %v4610_v7  ;;  %4214 = vmatpush3.bf16.msra.mxu0 %v4611_v1  ;;  %v1036_v19 = vpack.c.bf16 %v1020_v12, %v1020_v12  ;;  %v1038_v23 = vpack.c.bf16 %v1022_v13, %v1022_v13  ;;  %v643_v7 = vrot.slane %v5169_v2, %v5125_v26  ;;  %v4637_v1 = vld [vmem:[#allocation7 + $0x2f0] sm:$0xff]   ;;  %v4641_v13 = vld [vmem:[#allocation7 + $0x2f8] sm:$0xff]  }
 0x367   :  { %4221 = vmatprep.subr.bf16.mxu1 %v4612_v9  ;;  %4243 = vmatprep.subr.bf16.mxu0 %v4613_v10  ;;  %v882_v8 = vadd.f32 %v5175_v53, %v635_v58  ;;  %v4639_v9 = vld [vmem:[#allocation7 + $0x2b0] sm:$0xff]   ;;  %v4640_v10 = vld [vmem:[#allocation7 + $0x278] sm:$0xff]   ;;  %v4645_v53 = vld [vmem:[#allocation7 + $0x3c0] sm:$0xff]   ;;  %v651_v58 = vrot.slane %v5169_v2, %v5157_v36 }
 0x368   :  { %v923_v12 = vadd.f32 %v5177_v54, %v643_v7  ;;  %v4647_v54 = vld [vmem:[#allocation7 + $0x380] sm:$0xff]   ;;  %v4669_v7 = vld [vmem:[#allocation7 + $0x3f0] sm:$0xff]   ;;  %v4675_v2 = vld [vmem:[#allocation7 + $0x3b8] sm:$0xff]  }
 0x369   :  { %2180 = vmatmul.mubr.bf16.vlgmr.msra.gmra.mrb[20].mxu1 %v1031_v15  ;;  %2220 = vmatmul.mubr.bf16.vlgmr.msra.gmra.mrb[24].mxu0 %v1033_v16  ;;  %v4642_v16 = vld [vmem:[#allocation7 + $0x238] sm:$0xff]  }
 0x36a   :  { %4222 = vmatpush3.bf16.msra.mxu1 %v4614_v14  ;;  %2259 = vmatprep.mubr.bf16.mxu1 %v1036_v19  ;;  %v4643_v19 = vld [vmem:[#allocation7 + $0x2b8] sm:$0xff]  }
 0x36b   :  { %4244 = vmatpush3.bf16.msra.mxu0 %v4615_v18  ;;  %2299 = vmatprep.mubr.bf16.mxu0 %v1038_v23  ;;  %v1019_v18 = vmax.f32 %v882_v8, 0.0  ;;  %v4673_v8 = vld [vmem:[#allocation7 + $0x3f8] sm:$0xff]  }
 0x36c   :  { %4223 = vmatprep.subr.bf16.mxu1 %v4616_v20  ;;  %4245 = vmatprep.subr.bf16.mxu0 %v4617_v22  ;;  %v4644_v20 = vld [vmem:[#allocation7 + $0x340] sm:$0xff]   ;;  %v1021_v22 = vmax.f32 %v923_v12, 0.0 }
 0x36e   :  { %4224 = vmatpush3.bf16.msra.mxu1 %v4618_v24 }
 0x36f   :  { %4246 = vmatpush3.bf16.msra.mxu0 %v4619_v29  ;;  %4225 = vmatprep.subr.bf16.mxu1 %v4620_v30  ;;  %v4646_v29 = vld [vmem:[#allocation7 + $0x300] sm:$0xff]   ;;  %v1035_v30 = vpack.c.bf16 %v1019_v18, %v1019_v18 }
 0x370   :  { %v5181_v38 = vpop.f32.mrb[12].mxu1  ;;  %v1004_v39 = vpop.f32.mrb[16].mxu0  ;;  %4247 = vmatprep.subr.bf16.mxu0 %v4621_v31  ;;  %v1037_v31 = vpack.c.bf16 %v1021_v22, %v1021_v22 }
 0x371   :  { %v5183_v41 = vadd.f32 %v1004_v39, %v659_v32  ;;  %v965_v42 = vpop.f32.mrb[13].mxu1  ;;  %v1006_v43 = vpop.f32.mrb[17].mxu0  ;;  %v4648_v32 = vld [vmem:[#allocation7 + $0x348] sm:$0xff]  }
 0x372   :  { %v967_v44 = vpop.f32.mrb[14].mxu1  ;;  %v1008_v45 = vpop.f32.mrb[18].mxu0  ;;  %4226 = vmatpush3.bf16.msra.mxu1 %v4622_v33  ;;  %v966_v14 = vadd.f32 %v965_v42, %v655_v3  ;;  %v1007_v15 = vadd.f32 %v1006_v43, %v663_v4  ;;  %v4650_v39 = vld [vmem:[#allocation7 + $0x308] sm:$0xff]   ;;  %v4652_v42 = vld [vmem:[#allocation7 + $0x350] sm:$0xff]   ;;  %v964_v3 = vadd.f32 %v5181_v38, %v651_v58 }
 0x373   :  { %4248 = vmatpush3.bf16.msra.mxu0 %v4623_v34  ;;  %v968_v47 = vpop.f32.mrb[15].mxu1  ;;  %v1009_v48 = vpop.f32.mrb[19].mxu0  ;;  %4227 = vmatprep.subr.bf16.mxu1 %v4624_v35  ;;  %v4649_v34 = vld [vmem:[#allocation7 + $0x3c8] sm:$0xff]   ;;  %v4653_v43 = vld [vmem:[#allocation7 + $0x3d0] sm:$0xff]   ;;  %v1025_v12 = vmax.f32 %v5183_v41, 0.0 }
 0x374   :  { %4249 = vmatprep.subr.bf16.mxu0 %v4625_v40  ;;  %v1024_v23 = vmax.f32 %v966_v14, 0.0  ;;  %v1026_v24 = vmax.f32 %v1007_v15, 0.0  ;;  %v4651_v40 = vld [vmem:[#allocation7 + $0x388] sm:$0xff]   ;;  %v4654_v44 = vld [vmem:[#allocation7 + $0x310] sm:$0xff]   ;;  %v4657_v47 = vld [vmem:[#allocation7 + $0x3d8] sm:$0xff]  }
 0x375   :  { %v4655_v45 = vld [vmem:[#allocation7 + $0x390] sm:$0xff]   ;;  %v4658_v48 = vld [vmem:[#allocation7 + $0x318] sm:$0xff]   ;;  %v1041_v38 = vpack.c.bf16 %v1025_v12, %v1025_v12  ;;  %v4689_v14 = vld [vmem:[#allocation2] sm:$0xff]  }
 0x376   :  { %4228 = vmatpush3.bf16.msra.mxu1 %v4626_v46  ;;  %v1040_v33 = vpack.c.bf16 %v1024_v23, %v1024_v23  ;;  %v1042_v35 = vpack.c.bf16 %v1026_v24, %v1026_v24  ;;  %v4656_v46 = vld [vmem:[#allocation7 + $0x358] sm:$0xff]   ;;  %v4671_v4 = vld [vmem:[#allocation7 + $0x3b0] sm:$0xff]   ;;  %v4690_v15 = vld [vmem:[#allocation2 + $0x8] sm:$0xff]  }
 0x377   :  { %4250 = vmatpush3.bf16.msra.mxu0 %v4627_v49  ;;  %4229 = vmatprep.subr.bf16.mxu1 %v4628_v27  ;;  %v4659_v49 = vld [vmem:[#allocation7 + $0x398] sm:$0xff]   ;;  %v4660_v27 = vld [vmem:[#allocation7 + $0x360] sm:$0xff]   ;;  %v4691_v41 = vld [vmem:[#allocation2 + $0x10] sm:$0xff]  }
 0x378   :  { %4251 = vmatprep.subr.bf16.mxu0 %v4629_v50  ;;  %v4661_v50 = vld [vmem:[#allocation7 + $0x3e0] sm:$0xff]  }
 0x37a   :  { %4230 = vmatpush3.bf16.msra.mxu1 %v4630_v51  ;;  %v4662_v51 = vld [vmem:[#allocation7 + $0x320] sm:$0xff]  }
 0x37b   :  { %4252 = vmatpush3.bf16.msra.mxu0 %v4631_v52  ;;  %4231 = vmatprep.subr.bf16.mxu1 %v4632_v55  ;;  %v4663_v52 = vld [vmem:[#allocation7 + $0x3a0] sm:$0xff]   ;;  %v4664_v55 = vld [vmem:[#allocation7 + $0x368] sm:$0xff]  }
 0x37c   :  { %4253 = vmatprep.subr.bf16.mxu0 %v4633_v56  ;;  %v4665_v56 = vld [vmem:[#allocation7 + $0x3e8] sm:$0xff]  }
 0x37e   :  { %4232 = vmatpush3.bf16.msra.mxu1 %v4634_v57  ;;  %v4666_v57 = vld [vmem:[#allocation7 + $0x328] sm:$0xff]  }
 0x37f   :  { %4254 = vmatpush3.bf16.msra.mxu0 %v4635_v62  ;;  %4233 = vmatprep.subr.bf16.mxu1 %v4636_v63  ;;  %v4667_v62 = vld [vmem:[#allocation7 + $0x3a8] sm:$0xff]   ;;  %v4668_v63 = vld [vmem:[#allocation7 + $0x370] sm:$0xff]  }
 0x380   :  { %4255 = vmatprep.subr.bf16.mxu0 %v4637_v1  ;;  %v4670_v1 = vld [vmem:[#allocation7 + $0x330] sm:$0xff]  }
 0x382   :  { %4234 = vmatpush3.bf16.msra.mxu1 %v4638_v6  ;;  %v4672_v6 = vld [vmem:[#allocation7 + $0x378] sm:$0xff]  }
 0x383   :  { %4256 = vmatpush3.bf16.msra.mxu0 %v4639_v9  ;;  %4235 = vmatprep.subr.bf16.mxu1 %v4640_v10  ;;  %v4674_v9 = vld [vmem:[#allocation7 + $0x338] sm:$0xff]   ;;  %v1023_v10 = vmax.f32 %v964_v3, 0.0 }
 0x384   :  { %4257 = vmatprep.subr.bf16.mxu0 %v4641_v13 }
 0x385   :  { %v1039_v13 = vpack.c.bf16 %v1023_v10, %v1023_v10 }
 0x386   :  { %4236 = vmatpush3.bf16.msra.mxu1 %v4642_v16  ;;  %v4692_v16 = vld [vmem:[#allocation2 + $0x18] sm:$0xff]  }
 0x387   :  { %4258 = vmatpush3.bf16.msra.mxu0 %v4643_v19  ;;  %4265 = vmatprep.subr.bf16.mxu1 %v4644_v20 }
 0x388   :  { %4287 = vmatprep.subr.bf16.mxu0 %v4645_v53 }
 0x389   :  { %2260 = vmatmul.mubr.bf16.vlgmr.msra.gmra.mrb[24].mxu1 %v1035_v30 }
 0x38a   :  { %2300 = vmatmul.mubr.bf16.vlgmr.msra.gmra.mrb[28].mxu0 %v1037_v31  ;;  %4266 = vmatpush3.bf16.msra.mxu1 %v4646_v29 }
 0x38b   :  { %2339 = vmatprep.mubr.bf16.mxu1 %v1040_v33  ;;  %4288 = vmatpush3.bf16.msra.mxu0 %v4647_v54 }
 0x38c   :  { %2379 = vmatprep.mubr.bf16.mxu0 %v1042_v35  ;;  %4267 = vmatprep.subr.bf16.mxu1 %v4648_v32 }
 0x38d   :  { %4289 = vmatprep.subr.bf16.mxu0 %v4649_v34 }
 0x38e   :  { %4268 = vmatpush3.bf16.msra.mxu1 %v4650_v39 }
 0x38f   :  { %4290 = vmatpush3.bf16.msra.mxu0 %v4651_v40  ;;  %4269 = vmatprep.subr.bf16.mxu1 %v4652_v42 }
 0x390   :  { %4291 = vmatprep.subr.bf16.mxu0 %v4653_v43 }
 0x392   :  { %4270 = vmatpush3.bf16.msra.mxu1 %v4654_v44 }
 0x393   :  { %4292 = vmatpush3.bf16.msra.mxu0 %v4655_v45  ;;  %4271 = vmatprep.subr.bf16.mxu1 %v4656_v46 }
 0x394   :  { %4293 = vmatprep.subr.bf16.mxu0 %v4657_v47 }
 0x396   :  { %4272 = vmatpush3.bf16.msra.mxu1 %v4658_v48 }
 0x397   :  { %4294 = vmatpush3.bf16.msra.mxu0 %v4659_v49  ;;  %4273 = vmatprep.subr.bf16.mxu1 %v4660_v27 }
 0x398   :  { %4295 = vmatprep.subr.bf16.mxu0 %v4661_v50 }
 0x39a   :  { %4274 = vmatpush3.bf16.msra.mxu1 %v4662_v51 }
 0x39b   :  { %4296 = vmatpush3.bf16.msra.mxu0 %v4663_v52  ;;  %4275 = vmatprep.subr.bf16.mxu1 %v4664_v55 }
 0x39c   :  { %4297 = vmatprep.subr.bf16.mxu0 %v4665_v56 }
 0x39e   :  { %4276 = vmatpush3.bf16.msra.mxu1 %v4666_v57 }
 0x39f   :  { %4298 = vmatpush3.bf16.msra.mxu0 %v4667_v62  ;;  %4277 = vmatprep.subr.bf16.mxu1 %v4668_v63 }
 0x3a0   :  { %4299 = vmatprep.subr.bf16.mxu0 %v4669_v7 }
 0x3a2   :  { %4278 = vmatpush3.bf16.msra.mxu1 %v4670_v1 }
 0x3a3   :  { %4300 = vmatpush3.bf16.msra.mxu0 %v4671_v4  ;;  %4279 = vmatprep.subr.bf16.mxu1 %v4672_v6 }
 0x3a4   :  { %4301 = vmatprep.subr.bf16.mxu0 %v4673_v8 }
 0x3a6   :  { %4280 = vmatpush3.bf16.msra.mxu1 %v4674_v9 }
 0x3a7   :  { %4302 = vmatpush3.bf16.msra.mxu0 %v4675_v2  ;;  %4507 = vmatprep.subr.bf16.mxu1 %v4948_v0 }
 0x3a9   :  { %2340 = vmatmul.mubr.bf16.vlgmr.msra.gmra.mrb[28].mxu1 %v1039_v13 }
 0x3aa   :  { %2380 = vmatmul.mubr.bf16.vlgmr.msra.gmra.mrb[32].mxu0 %v1041_v38  ;;  %4508 = vmatpush3.bf16.msra.mxu1 %v4689_v14  ;;  %v4693_v38 = vld [vmem:[%s5367_s5] sm:$0x3f] }
 0x3ab   :  { %4509 = vmatprep.subr.bf16.mxu1 %v4948_v0  ;;  %4515 = vmatprep.mubr.msk.bf16.mxu1 %vm4949_vm0, %v4948_v0  ;;  %v2387_v14 = vrot.slane %v4693_v38, 5 }
 0x3ac   :  { %3041 = vmatprep.mubr.bf16.mxu0 %v4950_v60 }
 0x3ae   :  { %4510 = vmatpush3.bf16.msra.mxu1 %v4690_v15 }
 0x3af   :  { %4511 = vmatprep.subr.bf16.mxu1 %v4948_v0 }
 0x3b2   :  { %4512 = vmatpush3.bf16.msra.mxu1 %v4691_v41 }
 0x3b3   :  { %4513 = vmatprep.subr.bf16.mxu1 %v4948_v0 }
 0x3b6   :  { %4514 = vmatpush3.bf16.msra.mxu1 %v4692_v16 }
 0x41c   :  { %v4149_v18 = vpop.f32.mrb[16].mxu1  ;;  %v4171_v19 = vpop.f32.mrb[20].mxu0 }
 0x41d   :  { %v4150_v20 = vpop.f32.mrb[17].mxu1  ;;  %v4172_v22 = vpop.f32.mrb[21].mxu0 }
 0x41e   :  { %v4151_v53 = vadd.f32 %v4150_v20, %v4149_v18  ;;  %v4173_v23 = vadd.f32 %v4172_v22, %v4171_v19  ;;  %v4152_v24 = vpop.f32.mrb[18].mxu1  ;;  %v4174_v29 = vpop.f32.mrb[22].mxu0 }
 0x41f   :  { %v4153_v30 = vpop.f32.mrb[19].mxu1  ;;  %v4175_v54 = vpop.f32.mrb[23].mxu0  ;;  %v5215_v24 = vld [vmem:[%s5367_s5 + $0x8] sm:$0x3f] }
 0x420   :  { %v2142_v31 = vadd.f32 %v4173_v23, %v4151_v53  ;;  %2471 = vrot.lane.b32.xlu0 %v5215_v24, %s4943_s16  ;;  %v2407_v54 = vcombine.high %v4693_v38, %v4693_v38 }
 0x43c   :  { %v4193_v32 = vpop.f32.mrb[20].mxu1  ;;  %v4215_v33 = vpop.f32.mrb[24].mxu0 }
 0x43d   :  { %v4194_v34 = vpop.f32.mrb[21].mxu1  ;;  %v4216_v35 = vpop.f32.mrb[25].mxu0 }
 0x43e   :  { %v4195_v39 = vadd.f32 %v4194_v34, %v4193_v32  ;;  %v4217_v40 = vadd.f32 %v4216_v35, %v4215_v33  ;;  %v4196_v42 = vpop.f32.mrb[22].mxu1  ;;  %v4218_v43 = vpop.f32.mrb[26].mxu0  ;;  %v2404_v32 = vcombine.high %v5089_v11, %v5089_v11 }
 0x43f   :  { %v4197_v44 = vpop.f32.mrb[23].mxu1  ;;  %v4219_v45 = vpop.f32.mrb[27].mxu0 }
 0x440   :  { %v2182_v46 = vadd.f32 %v4195_v39, %v2142_v31  ;;  %v2414_v31 = vrot.slane %v2407_v54, %v5083_v5 }
 0x442   :  { %v2222_v47 = vadd.f32 %v4217_v40, %v2182_v46  ;;  %v2421_v34 = vrot.slane %v2414_v31, %v5083_v5  ;;  %v2593_v31 = vld [vmem:[#allocation5 + $0x3c8] sm:$0xff] }
 0x45c   :  { %v4237_v48 = vpop.f32.mrb[24].mxu1 }
 0x45d   :  { %v4259_v49 = vpop.f32.mrb[28].mxu0  ;;  %v4238_v27 = vpop.f32.mrb[25].mxu1 }
 0x45e   :  { %v4239_v50 = vadd.f32 %v4238_v27, %v4237_v48  ;;  %v4260_v51 = vpop.f32.mrb[29].mxu0  ;;  %v4240_v52 = vpop.f32.mrb[26].mxu1 }
 0x45f   :  { %v4261_v55 = vadd.f32 %v4260_v51, %v4259_v49  ;;  %v4262_v56 = vpop.f32.mrb[30].mxu0  ;;  %v4241_v57 = vpop.f32.mrb[27].mxu1 }
 0x460   :  { %v2262_v58 = vadd.f32 %v4239_v50, %v2222_v47  ;;  %v4263_v62 = vpop.f32.mrb[31].mxu0 }
 0x461   :  { %v2536_v62 = vld [vmem:[#allocation5 + $0x200] sm:$0xff] }
 0x462   :  { %v2302_v63 = vadd.f32 %v4261_v55, %v2262_v58 }
 0x47c   :  { %v4281_v7 = vpop.f32.mrb[28].mxu1 }
 0x47d   :  { %v4303_v1 = vpop.f32.mrb[32].mxu0  ;;  %v4282_v3 = vpop.f32.mrb[29].mxu1 }
 0x47e   :  { %v4283_v4 = vadd.f32 %v4282_v3, %v4281_v7  ;;  %v4304_v6 = vpop.f32.mrb[33].mxu0  ;;  %v4284_v8 = vpop.f32.mrb[30].mxu1  ;;  %v2537_v7 = vld [vmem:[#allocation5 + $0x208] sm:$0xff] }
 0x47f   :  { %v4305_v9 = vadd.f32 %v4304_v6, %v4303_v1  ;;  %v4306_v10 = vpop.f32.mrb[34].mxu0  ;;  %v4285_v2 = vpop.f32.mrb[31].mxu1  ;;  %v2545_v3 = vld [vmem:[#allocation5 + $0x248] sm:$0xff] }
 0x480   :  { %v2342_v12 = vadd.f32 %v4283_v4, %v2302_v63  ;;  %v4307_v13 = vpop.f32.mrb[35].mxu0  ;;  %v2544_v63 = vld [vmem:[#allocation5 + $0x240] sm:$0xff]  ;;  %v4053_v6 = vcombine.low %v2537_v7, %v2545_v3  ;;  %v4054_v8 = vcombine.high %v2537_v7, %v2545_v3  ;;  %v2553_v2 = vld [vmem:[#allocation5 + $0x288] sm:$0xff]  ;;  %v2555_v7 = vld [vmem:[#allocation5 + $0x298] sm:$0xff] }
 0x481   :  { %v4052_v1 = vcombine.high %v2536_v62, %v2544_v63  ;;  %v4051_v4 = vcombine.low %v2536_v62, %v2544_v63  ;;  %v2560_v10 = vld [vmem:[#allocation5 + $0x2c0] sm:$0xff]  ;;  %v2561_v13 = vld [vmem:[#allocation5 + $0x2c8] sm:$0xff]  ;;  %v2554_v62 = vld [vmem:[#allocation5 + $0x290] sm:$0xff] }
 0x482   :  { %v2382_v15 = vadd.f32 %v4305_v9, %v2342_v12  ;;  %3050 = vmatprep.subr.bf16.mxu1 %v4054_v8  ;;  %v2552_v9 = vld [vmem:[#allocation5 + $0x280] sm:$0xff]  ;;  %v2562_v63 = vld [vmem:[#allocation5 + $0x2d0] sm:$0xff] }
 0x483   :  { %3009 = vmatprep.subr.bf16.mxu0 %v4052_v1  ;;  %v4068_v12 = vcombine.high %v2552_v9, %v2560_v10  ;;  %v4067_v38 = vcombine.low %v2552_v9, %v2560_v10  ;;  %v2563_v1 = vld [vmem:[#allocation5 + $0x2d8] sm:$0xff]  ;;  %v2570_v9 = vld [vmem:[#allocation5 + $0x310] sm:$0xff] }
 0x484   :  { %v2389_v41 = vadd.f32 %v2387_v14, %v2382_v15  ;;  %3010 = vmatpush1.bf16.msra.mxu0 %v4051_v4  ;;  %v4069_v14 = vcombine.low %v2553_v2, %v2561_v13  ;;  %v4070_v15 = vcombine.high %v2553_v2, %v2561_v13  ;;  %v4074_v8 = vcombine.high %v2555_v7, %v2563_v1  ;;  %v2578_v10 = vld [vmem:[#allocation5 + $0x350] sm:$0xff]  ;;  %v2571_v2 = vld [vmem:[#allocation5 + $0x318] sm:$0xff] }
 0x485   :  { %3011 = vmatprep.subr.bf16.mxu0 %v4068_v12  ;;  %v2579_v12 = vld [vmem:[#allocation5 + $0x358] sm:$0xff]  ;;  %v4073_v13 = vcombine.low %v2555_v7, %v2563_v1 }
 0x486   :  { %v2390_v16 = vadd.f32 %v2389_v41, %v5093_v21  ;;  %v2568_v41 = vld [vmem:[#allocation5 + $0x300] sm:$0xff] }
 0x488   :  { %v2391_v18 = vsel %vm167_vm2, %v2390_v16, 0.0  ;;  %3012 = vmatpush1.bf16.msra.mxu0 %v4067_v38  ;;  %v4088_v38 = vcombine.high %v2570_v9, %v2578_v10 }
 0x489   :  { %2392 = vadd.xlane.f32.xlu1 %v2391_v18  ;;  %v2569_v18 = vld [vmem:[#allocation5 + $0x308] sm:$0xff] }
 0x492   :  { %v2472_v43 = vpop.permute.xlu0 %2471 }
 0x516   :  { %v2393_v19 = vpop.xlane.xlu1 %2392 }
 0x517   :  { %v2394_v20 = vmul.f32 0.015625, %v2393_v19 }
 0x519   :  { %v2395_v22 = vsub.f32 %v2390_v16, %v2394_v20  ;;  %v2576_v16 = vld [vmem:[#allocation5 + $0x340] sm:$0xff]  ;;  %v2577_v20 = vld [vmem:[#allocation5 + $0x348] sm:$0xff] }
 0x51a   :  { %v4084_v19 = vcombine.high %v2568_v41, %v2576_v16 }
 0x51b   :  { %v2396_v53 = vmul.f32 %v2395_v22, %v2395_v22 }
 0x51c   :  { %3013 = vmatprep.subr.bf16.mxu0 %v4084_v19  ;;  %v4087_v19 = vcombine.low %v2570_v9, %v2578_v10  ;;  %v2550_v9 = vld [vmem:[#allocation5 + $0x270] sm:$0xff]  ;;  %v2543_v10 = vld [vmem:[#allocation5 + $0x238] sm:$0xff] }
 0x51d   :  { %v2397_v23 = vsel %vm167_vm2, %v2396_v53, 0.0  ;;  %v4085_v53 = vcombine.low %v2569_v18, %v2577_v20 }
 0x51e   :  { %2398 = vadd.xlane.f32.xlu1 %v2397_v23  ;;  %v4086_v23 = vcombine.high %v2569_v18, %v2577_v20  ;;  %v2595_v18 = vld [vmem:[#allocation5 + $0x3d8] sm:$0xff]  ;;  %v4089_v20 = vcombine.low %v2571_v2, %v2579_v12 }
 0x5ab   :  { %v2399_v29 = vpop.xlane.xlu1 %2398 }
 0x5ac   :  { %v2400_v21 = vmul.f32 0.015625, %v2399_v29  ;;  %v2584_v29 = vld [vmem:[#allocation5 + $0x380] sm:$0xff] }
 0x5ae   :  { %v2401_v30 = vadd.f32 1e-05, %v2400_v21  ;;  %v2592_v21 = vld [vmem:[#allocation5 + $0x3c0] sm:$0xff] }
 0x5af   :  { %v4100_v54 = vcombine.high %v2584_v29, %v2592_v21 }
 0x5b0   :  { %4683 = vrsqrt.f32 %v2401_v30  ;;  %v2585_v30 = vld [vmem:[#allocation5 + $0x388] sm:$0xff] }
 0x5ba   :  { %v4684_v33 = vpop.eup %4683 }
 0x5bb   :  { %v2403_v35 = vmul.f32 %v4684_v33, %v2395_v22  ;;  %v4083_v22 = vcombine.low %v2568_v41, %v2576_v16  ;;  %v4101_v33 = vcombine.low %v2585_v30, %v2593_v31  ;;  %v2594_v41 = vld [vmem:[#allocation5 + $0x3d0] sm:$0xff]  ;;  %v2587_v16 = vld [vmem:[#allocation5 + $0x398] sm:$0xff] }
 0x5bd   :  { %v2406_v39 = vmul.f32 %v2404_v32, %v2403_v35  ;;  %3014 = vmatpush1.bf16.msra.mxu0 %v4083_v22  ;;  %v4099_v32 = vcombine.low %v2584_v29, %v2592_v21  ;;  %v2538_v35 = vld [vmem:[#allocation5 + $0x210] sm:$0xff]  ;;  %v2548_v29 = vld [vmem:[#allocation5 + $0x260] sm:$0xff]  ;;  %v2541_v21 = vld [vmem:[#allocation5 + $0x228] sm:$0xff] }
 0x5be   :  { %3015 = vmatprep.subr.bf16.mxu0 %v4100_v54 }
 0x5bf   :  { %v2423_v40 = vadd.f32 %v2421_v34, %v2406_v39  ;;  %v4102_v34 = vcombine.high %v2585_v30, %v2593_v31  ;;  %v2546_v39 = vld [vmem:[#allocation5 + $0x250] sm:$0xff]  ;;  %v2549_v30 = vld [vmem:[#allocation5 + $0x268] sm:$0xff]  ;;  %v4105_v31 = vcombine.low %v2587_v16, %v2595_v18 }
 0x5c1   :  { %v2426_v42 = vpack.c.bf16 %v2423_v40, %v2423_v40  ;;  %3016 = vmatpush1.bf16.msra.mxu0 %v4099_v32 }
 0x5c3   :  { %4516 = vmatmul.mubr.msk.bf16.vlgmr.msra.gmra.mrb[32].mxu1 %vm121_vm1, %v2426_v42  ;;  %v4055_v42 = vcombine.low %v2538_v35, %v2546_v39 }
 0x5c4   :  { %3082 = vmatprep.mubr.bf16.mxu1 %v4950_v60  ;;  %3051 = vmatpush1.bf16.msra.mxu1 %v4053_v6  ;;  %v4072_v6 = vcombine.high %v2554_v62, %v2562_v63 }
 0x5c5   :  { %3052 = vmatprep.subr.bf16.mxu1 %v4070_v15  ;;  %v2586_v15 = vld [vmem:[#allocation5 + $0x390] sm:$0xff] }
 0x5c6   :  { %v4104_v22 = vcombine.high %v2586_v15, %v2594_v41  ;;  %v4103_v54 = vcombine.low %v2586_v15, %v2594_v41  ;;  %v2566_v15 = vld [vmem:[#allocation5 + $0x2f0] sm:$0xff]  ;;  %v2559_v41 = vld [vmem:[#allocation5 + $0x2b8] sm:$0xff] }
 0x5c8   :  { %3053 = vmatpush1.bf16.msra.mxu1 %v4069_v14  ;;  %v4090_v14 = vcombine.high %v2571_v2, %v2579_v12  ;;  %v2551_v2 = vld [vmem:[#allocation5 + $0x278] sm:$0xff] }
 0x5c9   :  { %3054 = vmatprep.subr.bf16.mxu1 %v4086_v23  ;;  %v2540_v23 = vld [vmem:[#allocation5 + $0x220] sm:$0xff] }
 0x5ca   :  { %v4060_v32 = vcombine.high %v2540_v23, %v2548_v29 }
 0x5cc   :  { %3055 = vmatpush1.bf16.msra.mxu1 %v4085_v53  ;;  %v4106_v53 = vcombine.high %v2587_v16, %v2595_v18  ;;  %v2567_v16 = vld [vmem:[#allocation5 + $0x2f8] sm:$0xff] }
 0x5cd   :  { %3056 = vmatprep.subr.bf16.mxu1 %v4102_v34  ;;  %v2556_v34 = vld [vmem:[#allocation5 + $0x2a0] sm:$0xff] }
 0x5d0   :  { %3057 = vmatpush1.bf16.msra.mxu1 %v4101_v33  ;;  %v4062_v33 = vcombine.high %v2541_v21, %v2549_v30 }
 0x696   :  { %v2464_v44 = vpop.f32.mrb[32].mxu1 }
 0x697   :  { %v2474_v45 = vadd.f32 %v2472_v43, %v2464_v44  ;;  %v4517_v46 = vpop.f32.mrb[33].mxu1  ;;  %v4056_v43 = vcombine.high %v2538_v35, %v2546_v39  ;;  %v2547_v44 = vld [vmem:[#allocation5 + $0x258] sm:$0xff]  ;;  %v2564_v35 = vld [vmem:[#allocation5 + $0x2e0] sm:$0xff]  ;;  %v2557_v39 = vld [vmem:[#allocation5 + $0x2a8] sm:$0xff] }
 0x698   :  { %v2467_v47 = vpop.f32.mrb[34].mxu1 }
 0x699   :  { %v2482_v48 = vrot.slane %v2474_v45, %v5083_v5  ;;  %v4518_v49 = vpop.f32.mrb[35].mxu1  ;;  %3091 = vmatprep.subr.bf16.mxu0 %v4056_v43  ;;  %v4061_v43 = vcombine.low %v2541_v21, %v2549_v30  ;;  %v2583_v21 = vld [vmem:[#allocation5 + $0x378] sm:$0xff] }
 0x69b   :  { %v2489_v11 = vrot.slane %v2482_v48, %v5083_v5 }
 0x69d   :  { %2490 = vrot.lane.b32.xlu1 %v2489_v11, %s4943_s16  ;;  %v2513_v11 = vrot.slane %v5215_v24, %v5083_v5 }
 0x70f   :  { %v2491_v27 = vpop.permute.xlu1 %2490 }
 0x710   :  { %v2493_v50 = vadd.f32 %v2491_v27, %v2423_v40  ;;  %v2539_v40 = vld [vmem:[#allocation5 + $0x218] sm:$0xff]  ;;  %v2514_v27 = vcombine.high %v2513_v11, %v2513_v11 }
 0x711   :  { %v4057_v45 = vcombine.low %v2539_v40, %v2547_v44  ;;  %v4058_v46 = vcombine.high %v2539_v40, %v2547_v44  ;;  %v2565_v40 = vld [vmem:[#allocation5 + $0x2e8] sm:$0xff]  ;;  %v4076_v44 = vcombine.high %v2556_v34, %v2564_v35 }
 0x712   :  { %v2494_v51 = vsel %vm167_vm2, %v2493_v50, 0.0 }
 0x713   :  { %2495 = vadd.xlane.f32.xlu1 %v2494_v51  ;;  %3132 = vmatprep.subr.bf16.mxu1 %v4058_v46  ;;  %v5238_v51 = vrot.slane %v2514_v27, %v5083_v5  ;;  %v2572_v46 = vld [vmem:[#allocation5 + $0x320] sm:$0xff]  ;;  %v4077_v27 = vcombine.low %v2557_v39, %v2565_v40 }
 0x7a0   :  { %v2496_v52 = vpop.xlane.xlu1 %2495 }
 0x7a1   :  { %v2497_v55 = vmul.f32 0.015625, %v2496_v52 }
 0x7a3   :  { %v5229_v56 = vsub.f32 %v2493_v50, %v2497_v55  ;;  %v2521_v50 = vrot.slane %v2513_v11, %v5083_v5  ;;  %v4075_v11 = vcombine.low %v2556_v34, %v2564_v35  ;;  %v2598_v34 = vld [vmem:[#allocation5 + $0x3f0] sm:$0xff]  ;;  %v2591_v35 = vld [vmem:[#allocation5 + $0x3b8] sm:$0xff] }
 0x7a5   :  { %v2499_v57 = vmul.f32 %v5229_v56, %v5229_v56  ;;  %v2531_v55 = vcombine.high %v2521_v50, %v2521_v50 }
 0x7a7   :  { %v2500_v58 = vsel %vm167_vm2, %v2499_v57, 0.0 }
 0x7a8   :  { %2501 = vadd.xlane.f32.xlu0 %v2500_v58 }
 0x835   :  { %v2502_v47 = vpop.xlane.xlu0 %2501 }
 0x836   :  { %v2503_v48 = vmul.f32 0.015625, %v2502_v47  ;;  %v2580_v47 = vld [vmem:[#allocation5 + $0x360] sm:$0xff] }
 0x837   :  { %v4092_v50 = vcombine.high %v2572_v46, %v2580_v47 }
 0x838   :  { %v2504_v49 = vadd.f32 1e-05, %v2503_v48  ;;  %v2573_v48 = vld [vmem:[#allocation5 + $0x328] sm:$0xff] }
 0x83a   :  { %4685 = vrsqrt.f32 %v2504_v49  ;;  %v2581_v49 = vld [vmem:[#allocation5 + $0x368] sm:$0xff] }
 0x83b   :  { %v4093_v7 = vcombine.low %v2573_v48, %v2581_v49 }
 0x844   :  { %v4686_v52 = vpop.eup %4685 }
 0x845   :  { %v2506_v57 = vmul.f32 %v4686_v52, %v5229_v56  ;;  %v4071_v56 = vcombine.low %v2554_v62, %v2562_v63  ;;  %v4094_v52 = vcombine.high %v2573_v48, %v2581_v49  ;;  %v2597_v62 = vld [vmem:[#allocation5 + $0x3e8] sm:$0xff]  ;;  %v4091_v63 = vcombine.low %v2572_v46, %v2580_v47  ;;  %v4694_v47 = vld [vmem:[#allocation7 + $0x40] sm:$0xff]  }
 0x846   :  { %v4695_v48 = vld [vmem:[#allocation7 + $0xc0] sm:$0xff]  }
 0x847   :  { %v2530_v58 = vmul.f32 %v5238_v51, %v2506_v57  ;;  %v2596_v57 = vld [vmem:[#allocation5 + $0x3e0] sm:$0xff] }
 0x848   :  { %v4697_v49 = vld [vmem:[#allocation7 + $0x80] sm:$0xff]  }
 0x849   :  { %v5242_v3 = vadd.f32 %v2531_v55, %v2530_v58  ;;  %v2588_v55 = vld [vmem:[#allocation5 + $0x3a0] sm:$0xff]  ;;  %v2589_v58 = vld [vmem:[#allocation5 + $0x3a8] sm:$0xff] }
 0x84a   :  { %v4108_v1 = vcombine.high %v2588_v55, %v2596_v57  ;;  %v4107_v12 = vcombine.low %v2588_v55, %v2596_v57  ;;  %v4702_v55 = vld [vmem:[#allocation7 + $0x50] sm:$0xff]  }
 0x84b   :  { %v5246_v4 = vpack.c.bf16 %v5242_v3, %v5242_v3  ;;  %v4703_v57 = vld [vmem:[#allocation7 + $0xd0] sm:$0xff]  }
 0x84d   :  { %4115 = vmatmul.mubr.msk.bf16.vlgmr.msra.gmra.mrb[36].mxu0 %vm121_vm1, %v5246_v4  ;;  %4116 = vmatmul.mubr.msk.bf16.vlgmr.msra.gmra.mrb[36].mxu1 %vm121_vm1, %v5246_v4 }
 0x84e   :  { %3092 = vmatpush1.bf16.msra.mxu0 %v4055_v42  ;;  %3133 = vmatpush1.bf16.msra.mxu1 %v4057_v45  ;;  %v4059_v42 = vcombine.low %v2540_v23, %v2548_v29  ;;  %v4078_v45 = vcombine.high %v2557_v39, %v2565_v40  ;;  %v2582_v23 = vld [vmem:[#allocation5 + $0x370] sm:$0xff]  ;;  %v2575_v29 = vld [vmem:[#allocation5 + $0x338] sm:$0xff] }
 0x84f   :  { %3093 = vmatprep.subr.bf16.mxu0 %v4072_v6  ;;  %3134 = vmatprep.subr.bf16.mxu1 %v4074_v8  ;;  %v4110_v6 = vcombine.high %v2589_v58, %v2597_v62  ;;  %v2542_v8 = vld [vmem:[#allocation5 + $0x230] sm:$0xff]  ;;  %v2599_v39 = vld [vmem:[#allocation5 + $0x3f8] sm:$0xff] }
 0x850   :  { %3123 = vmatprep.mubr.bf16.mxu0 %v4950_v60  ;;  %3164 = vmatprep.mubr.bf16.mxu1 %v4950_v60  ;;  %v4063_v18 = vcombine.low %v2542_v8, %v2550_v9  ;;  %v4113_v46 = vcombine.low %v2591_v35, %v2599_v39 }
 0x852   :  { %3094 = vmatpush1.bf16.msra.mxu0 %v4071_v56  ;;  %3135 = vmatpush1.bf16.msra.mxu1 %v4073_v13  ;;  %v4109_v56 = vcombine.low %v2589_v58, %v2597_v62  ;;  %v4064_v13 = vcombine.high %v2542_v8, %v2550_v9  ;;  %v4704_v58 = vld [vmem:[#allocation7 + $0x10] sm:$0xff]   ;;  %v4711_v8 = vld [vmem:[#allocation7 + $0xe0] sm:$0xff]  }
 0x853   :  { %3095 = vmatprep.subr.bf16.mxu0 %v4088_v38  ;;  %3136 = vmatprep.subr.bf16.mxu1 %v4090_v14  ;;  %v4066_v38 = vcombine.high %v2543_v10, %v2551_v2  ;;  %v2558_v14 = vld [vmem:[#allocation5 + $0x2b0] sm:$0xff]  ;;  %v4712_v9 = vld [vmem:[#allocation7 + $0x20] sm:$0xff]  }
 0x854   :  { %v4079_v30 = vcombine.low %v2558_v14, %v2566_v15  ;;  %v4705_v62 = vld [vmem:[#allocation7 + $0x90] sm:$0xff]  }
 0x856   :  { %3096 = vmatpush1.bf16.msra.mxu0 %v4087_v19  ;;  %3137 = vmatpush1.bf16.msra.mxu1 %v4089_v20  ;;  %v4065_v19 = vcombine.low %v2543_v10, %v2551_v2  ;;  %v4080_v20 = vcombine.high %v2558_v14, %v2566_v15  ;;  %v4713_v10 = vld [vmem:[#allocation7 + $0xa0] sm:$0xff]   ;;  %v4714_v2 = vld [vmem:[#allocation7 + $0x68] sm:$0xff]   ;;  %v4719_v14 = vld [vmem:[#allocation7 + $0xf0] sm:$0xff]  }
 0x857   :  { %3097 = vmatprep.subr.bf16.mxu0 %v4104_v22  ;;  %3138 = vmatprep.subr.bf16.mxu1 %v4106_v53  ;;  %v4082_v22 = vcombine.high %v2559_v41, %v2567_v16  ;;  %v2574_v53 = vld [vmem:[#allocation5 + $0x330] sm:$0xff] }
 0x858   :  { %v4095_v40 = vcombine.low %v2574_v53, %v2582_v23  ;;  %v4720_v15 = vld [vmem:[#allocation7 + $0x30] sm:$0xff]  }
 0x85a   :  { %3098 = vmatpush1.bf16.msra.mxu0 %v4103_v54  ;;  %3139 = vmatpush1.bf16.msra.mxu1 %v4105_v31  ;;  %v4081_v54 = vcombine.low %v2559_v41, %v2567_v16  ;;  %v4096_v31 = vcombine.high %v2574_v53, %v2582_v23  ;;  %v4721_v41 = vld [vmem:[#allocation7 + $0xb0] sm:$0xff]   ;;  %v4722_v16 = vld [vmem:[#allocation7 + $0x78] sm:$0xff]   ;;  %v4727_v53 = vld [vmem:[#allocation7 + $0x1c0] sm:$0xff]   ;;  %v3689_v23 = vrot.slane %v5215_v24, 5 }
 0x85b   :  { %3173 = vmatprep.subr.bf16.mxu0 %v4060_v32  ;;  %3214 = vmatprep.subr.bf16.mxu1 %v4062_v33  ;;  %v4098_v32 = vcombine.high %v2575_v29, %v2583_v21  ;;  %v2590_v33 = vld [vmem:[#allocation5 + $0x3b0] sm:$0xff] }
 0x85c   :  { %3690 = vrot.lane.b32.xlu0 %v3689_v23, %s4943_s16 }
 0x85d   :  { %4117 = vmatmul.mubr.msk.bf16.vlgmr.msra.gmra.mrb[40].mxu0 %vm121_vm1, %v5246_v4  ;;  %4118 = vmatmul.mubr.msk.bf16.vlgmr.msra.gmra.mrb[40].mxu1 %vm121_vm1, %v5246_v4 }
 0x85e   :  { %3174 = vmatpush1.bf16.msra.mxu0 %v4059_v42  ;;  %3215 = vmatpush1.bf16.msra.mxu1 %v4061_v43  ;;  %v4097_v42 = vcombine.low %v2575_v29, %v2583_v21  ;;  %v4112_v43 = vcombine.high %v2590_v33, %v2598_v34  ;;  %v5275_v29 = vld [vmem:[%s5366_s4 + $0x1] ss:$2 sm:$0xff] }
 0x85f   :  { %3175 = vmatprep.subr.bf16.mxu0 %v4076_v44  ;;  %3216 = vmatprep.subr.bf16.mxu1 %v4078_v45  ;;  %v4114_v44 = vcombine.high %v2591_v35, %v2599_v39  ;;  %v4111_v45 = vcombine.low %v2590_v33, %v2598_v34  ;;  %v2929_v21 = vrot.slane %v5275_v29, %v5122_v25 }
 0x860   :  { %3205 = vmatprep.mubr.bf16.mxu0 %v4950_v60  ;;  %3246 = vmatprep.mubr.bf16.mxu1 %v4950_v60 }
 0x862   :  { %3176 = vmatpush1.bf16.msra.mxu0 %v4075_v11  ;;  %3217 = vmatpush1.bf16.msra.mxu1 %v4077_v27  ;;  %v4698_v11 = vld [vmem:[#allocation7 + $0x48] sm:$0xff]  }
 0x863   :  { %3177 = vmatprep.subr.bf16.mxu0 %v4092_v50  ;;  %3218 = vmatprep.subr.bf16.mxu1 %v4094_v52  ;;  %v4699_v27 = vld [vmem:[#allocation7 + $0xc8] sm:$0xff]  }
 0x864   :  { %v4700_v50 = vld [vmem:[#allocation7 + $0x8] sm:$0xff]  }
 0x865   :  { %v4701_v52 = vld [vmem:[#allocation7 + $0x88] sm:$0xff]  }
 0x866   :  { %3178 = vmatpush1.bf16.msra.mxu0 %v4091_v63  ;;  %3219 = vmatpush1.bf16.msra.mxu1 %v4093_v7  ;;  %v4707_v63 = vld [vmem:[#allocation7 + $0xd8] sm:$0xff]  }
 0x867   :  { %3179 = vmatprep.subr.bf16.mxu0 %v4108_v1  ;;  %3220 = vmatprep.subr.bf16.mxu1 %v4110_v6  ;;  %v4708_v7 = vld [vmem:[#allocation7 + $0x18] sm:$0xff]   ;;  %v4710_v6 = vld [vmem:[#allocation7 + $0x60] sm:$0xff]  }
 0x868   :  { %v4709_v1 = vld [vmem:[#allocation7 + $0x98] sm:$0xff]  }
 0x86a   :  { %3180 = vmatpush1.bf16.msra.mxu0 %v4107_v12  ;;  %3221 = vmatpush1.bf16.msra.mxu1 %v4109_v56  ;;  %v4715_v12 = vld [vmem:[#allocation7 + $0xe8] sm:$0xff]  }
 0x86b   :  { %3255 = vmatprep.subr.bf16.mxu0 %v4064_v13  ;;  %3296 = vmatprep.subr.bf16.mxu1 %v4066_v38  ;;  %v4716_v56 = vld [vmem:[#allocation7 + $0x28] sm:$0xff]   ;;  %v4718_v38 = vld [vmem:[#allocation7 + $0x70] sm:$0xff]  }
 0x86c   :  { %v4717_v13 = vld [vmem:[#allocation7 + $0xa8] sm:$0xff]  }
 0x86d   :  { %4119 = vmatmul.mubr.msk.bf16.vlgmr.msra.gmra.mrb[44].mxu0 %vm121_vm1, %v5246_v4  ;;  %4120 = vmatmul.mubr.msk.bf16.vlgmr.msra.gmra.mrb[44].mxu1 %vm121_vm1, %v5246_v4 }
 0x86e   :  { %3256 = vmatpush1.bf16.msra.mxu0 %v4063_v18  ;;  %3297 = vmatpush1.bf16.msra.mxu1 %v4065_v19  ;;  %v4723_v18 = vld [vmem:[#allocation7 + $0xf8] sm:$0xff]  }
 0x86f   :  { %3257 = vmatprep.subr.bf16.mxu0 %v4080_v20  ;;  %3298 = vmatprep.subr.bf16.mxu1 %v4082_v22  ;;  %v4724_v19 = vld [vmem:[#allocation7 + $0x38] sm:$0xff]   ;;  %v4726_v22 = vld [vmem:[#allocation7 + $0x140] sm:$0xff]  }
 0x870   :  { %3287 = vmatprep.mubr.bf16.mxu0 %v4950_v60  ;;  %3328 = vmatprep.mubr.bf16.mxu1 %v4950_v60  ;;  %v4696_v60 = vld [vmem:[#allocation7] sm:$0xff]   ;;  %v4725_v20 = vld [vmem:[#allocation7 + $0xb8] sm:$0xff]  }
 0x872   :  { %3258 = vmatpush1.bf16.msra.mxu0 %v4079_v30  ;;  %3299 = vmatpush1.bf16.msra.mxu1 %v4081_v54  ;;  %v2937_v30 = vrot.slane %v5275_v29, %v5125_v26  ;;  %v2933_v54 = vrot.slane %v5275_v29, %v5133_v17 }
 0x873   :  { %3259 = vmatprep.subr.bf16.mxu0 %v4096_v31  ;;  %3300 = vmatprep.subr.bf16.mxu1 %v4098_v32  ;;  %v2941_v31 = vrot.slane %v5275_v29, %v5136_v28 }
 0x876   :  { %3260 = vmatpush1.bf16.msra.mxu0 %v4095_v40  ;;  %3301 = vmatpush1.bf16.msra.mxu1 %v4097_v42 }
 0x877   :  { %3261 = vmatprep.subr.bf16.mxu0 %v4112_v43  ;;  %3302 = vmatprep.subr.bf16.mxu1 %v4114_v44 }
 0x87a   :  { %3262 = vmatpush1.bf16.msra.mxu0 %v4111_v45  ;;  %3303 = vmatpush1.bf16.msra.mxu1 %v4113_v46 }
 0x87b   :  { %4314 = vmatprep.subr.bf16.mxu0 %v4694_v47  ;;  %4336 = vmatprep.subr.bf16.mxu1 %v4695_v48 }
 0x87d   :  { %4121 = vmatmul.mubr.msk.bf16.vlgmr.msra.gmra.mrb[48].mxu0 %vm121_vm1, %v5246_v4  ;;  %4122 = vmatmul.mubr.msk.bf16.vlgmr.msra.gmra.mrb[48].mxu1 %vm121_vm1, %v5246_v4  ;;  %v4706_v4 = vld [vmem:[#allocation7 + $0x58] sm:$0xff]  }
 0x87e   :  { %4315 = vmatpush3.bf16.msra.mxu0 %v4696_v60  ;;  %4337 = vmatpush3.bf16.msra.mxu1 %v4697_v49 }
 0x87f   :  { %4316 = vmatprep.subr.bf16.mxu0 %v4698_v11  ;;  %4338 = vmatprep.subr.bf16.mxu1 %v4699_v27 }
 0x882   :  { %4317 = vmatpush3.bf16.msra.mxu0 %v4700_v50  ;;  %4339 = vmatpush3.bf16.msra.mxu1 %v4701_v52 }
 0x883   :  { %4318 = vmatprep.subr.bf16.mxu0 %v4702_v55  ;;  %4340 = vmatprep.subr.bf16.mxu1 %v4703_v57  ;;  %v4728_v55 = vld [vmem:[#allocation7 + $0x100] sm:$0xff]  }
 0x884   :  { %v4729_v57 = vld [vmem:[#allocation7 + $0x180] sm:$0xff]  }
 0x886   :  { %4319 = vmatpush3.bf16.msra.mxu0 %v4704_v58  ;;  %4341 = vmatpush3.bf16.msra.mxu1 %v4705_v62  ;;  %v4730_v58 = vld [vmem:[#allocation7 + $0x148] sm:$0xff]  }
 0x887   :  { %4320 = vmatprep.subr.bf16.mxu0 %v4706_v4  ;;  %4342 = vmatprep.subr.bf16.mxu1 %v4707_v63  ;;  %v4731_v62 = vld [vmem:[#allocation7 + $0x1c8] sm:$0xff]  }
 0x888   :  { %v4732_v4 = vld [vmem:[#allocation7 + $0x108] sm:$0xff]  }
 0x889   :  { %v4733_v63 = vld [vmem:[#allocation7 + $0x188] sm:$0xff]  }
 0x88a   :  { %4321 = vmatpush3.bf16.msra.mxu0 %v4708_v7  ;;  %4343 = vmatpush3.bf16.msra.mxu1 %v4709_v1  ;;  %v2949_v7 = vrot.slane %v5275_v29, %v5147_v59  ;;  %v2957_v1 = vrot.slane %v5275_v29, %v5150_v61 }
 0x88b   :  { %4322 = vmatprep.subr.bf16.mxu0 %v4710_v6  ;;  %4344 = vmatprep.subr.bf16.mxu1 %v4711_v8  ;;  %v4734_v6 = vld [vmem:[#allocation7 + $0x150] sm:$0xff]  }
 0x88c   :  { %v4735_v8 = vld [vmem:[#allocation7 + $0x1d0] sm:$0xff]  }
 0x88e   :  { %4323 = vmatpush3.bf16.msra.mxu0 %v4712_v9  ;;  %4345 = vmatpush3.bf16.msra.mxu1 %v4713_v10 }
 0x88f   :  { %4324 = vmatprep.subr.bf16.mxu0 %v4714_v2  ;;  %4346 = vmatprep.subr.bf16.mxu1 %v4715_v12 }
 0x892   :  { %4325 = vmatpush3.bf16.msra.mxu0 %v4716_v56  ;;  %4347 = vmatpush3.bf16.msra.mxu1 %v4717_v13 }
 0x893   :  { %4326 = vmatprep.subr.bf16.mxu0 %v4718_v38  ;;  %4348 = vmatprep.subr.bf16.mxu1 %v4719_v14 }
 0x896   :  { %4327 = vmatpush3.bf16.msra.mxu0 %v4720_v15  ;;  %4349 = vmatpush3.bf16.msra.mxu1 %v4721_v41  ;;  %v4736_v15 = vld [vmem:[#allocation7 + $0x110] sm:$0xff]  }
 0x897   :  { %4328 = vmatprep.subr.bf16.mxu0 %v4722_v16  ;;  %4350 = vmatprep.subr.bf16.mxu1 %v4723_v18  ;;  %v4737_v41 = vld [vmem:[#allocation7 + $0x190] sm:$0xff]  }
 0x89a   :  { %4329 = vmatpush3.bf16.msra.mxu0 %v4724_v19  ;;  %4351 = vmatpush3.bf16.msra.mxu1 %v4725_v20  ;;  %v4738_v19 = vld [vmem:[#allocation7 + $0x158] sm:$0xff]  }
 0x89b   :  { %4358 = vmatprep.subr.bf16.mxu0 %v4726_v22  ;;  %4380 = vmatprep.subr.bf16.mxu1 %v4727_v53  ;;  %v4739_v20 = vld [vmem:[#allocation7 + $0x1d8] sm:$0xff]  }
 0x920   :  { %v3043_v24 = vpop.f32.mrb[36].mxu0  ;;  %v3084_v32 = vpop.f32.mrb[36].mxu1 }
 0x921   :  { %v3044_v33 = vadd.f32 %v3043_v24, %v2929_v21  ;;  %v3085_v34 = vadd.f32 %v3084_v32, %v2937_v30  ;;  %v3045_v35 = vpop.f32.mrb[37].mxu0  ;;  %v3086_v39 = vpop.f32.mrb[37].mxu1  ;;  %v4740_v30 = vld [vmem:[#allocation7 + $0x118] sm:$0xff]   ;;  %v4743_v24 = vld [vmem:[#allocation7 + $0x1e0] sm:$0xff]  }
 0x922   :  { %v3046_v40 = vadd.f32 %v3045_v35, %v2933_v54  ;;  %v3087_v42 = vadd.f32 %v3086_v39, %v2941_v31  ;;  %v3047_v43 = vpop.f32.mrb[38].mxu0  ;;  %v3088_v44 = vpop.f32.mrb[38].mxu1  ;;  %v4741_v54 = vld [vmem:[#allocation7 + $0x198] sm:$0xff]   ;;  %v4742_v31 = vld [vmem:[#allocation7 + $0x160] sm:$0xff]   ;;  %v2953_v35 = vrot.slane %v5275_v29, %v5160_v37  ;;  %v4746_v39 = vld [vmem:[#allocation7 + $0x168] sm:$0xff]  }
 0x923   :  { %v3337_v45 = vmax.f32 %v3044_v33, 0.0  ;;  %v3339_v46 = vmax.f32 %v3085_v34, 0.0  ;;  %v3048_v47 = vpop.f32.mrb[39].mxu0  ;;  %v3089_v48 = vpop.f32.mrb[39].mxu1  ;;  %v4744_v32 = vld [vmem:[#allocation7 + $0x120] sm:$0xff]   ;;  %v2945_v34 = vrot.slane %v5275_v29, %v5157_v36  ;;  %v4748_v43 = vld [vmem:[#allocation7 + $0x128] sm:$0xff]  }
 0x924   :  { %v3338_v60 = vmax.f32 %v3046_v40, 0.0  ;;  %v3340_v49 = vmax.f32 %v3087_v42, 0.0  ;;  %v4745_v33 = vld [vmem:[#allocation7 + $0x1a0] sm:$0xff]   ;;  %v4747_v40 = vld [vmem:[#allocation7 + $0x1e8] sm:$0xff]   ;;  %v5296_v42 = vld [vmem:[%s5366_s4 + $0x11] ss:$2 sm:$0xff] }
 0x925   :  { %v3353_v50 = vpack.c.bf16 %v3337_v45, %v3337_v45  ;;  %v3355_v52 = vpack.c.bf16 %v3339_v46, %v3339_v46  ;;  %v4749_v44 = vld [vmem:[#allocation7 + $0x1a8] sm:$0xff]   ;;  %v2965_v45 = vrot.slane %v5296_v42, %v5133_v17  ;;  %v2973_v46 = vrot.slane %v5296_v42, %v5136_v28  ;;  %v4750_v48 = vld [vmem:[#allocation7 + $0x170] sm:$0xff]  }
 0x926   :  { %v3354_v11 = vpack.c.bf16 %v3338_v60, %v3338_v60  ;;  %v3356_v27 = vpack.c.bf16 %v3340_v49, %v3340_v49  ;;  %v4751_v60 = vld [vmem:[#allocation7 + $0x1f0] sm:$0xff]  }
 0x927   :  { %v4752_v17 = vld [vmem:[#allocation7 + $0x130] sm:$0xff]  }
 0x928   :  { %3401 = vmatprep.mubr.bf16.mxu0 %v3354_v11  ;;  %3441 = vmatprep.mubr.bf16.mxu1 %v3356_v27 }
 0x929   :  { %3402 = vmatmul.mubr.bf16.vlgmr.msra.gmra.mrb[52].mxu0 %v3353_v50  ;;  %3442 = vmatmul.mubr.bf16.vlgmr.msra.gmra.mrb[52].mxu1 %v3355_v52 }
 0x92a   :  { %4359 = vmatpush3.bf16.msra.mxu0 %v4728_v55  ;;  %4381 = vmatpush3.bf16.msra.mxu1 %v4729_v57 }
 0x92b   :  { %4360 = vmatprep.subr.bf16.mxu0 %v4730_v58  ;;  %4382 = vmatprep.subr.bf16.mxu1 %v4731_v62  ;;  %v4753_v62 = vld [vmem:[#allocation7 + $0x1b0] sm:$0xff]  }
 0x92e   :  { %4361 = vmatpush3.bf16.msra.mxu0 %v4732_v4  ;;  %4383 = vmatpush3.bf16.msra.mxu1 %v4733_v63 }
 0x92f   :  { %4362 = vmatprep.subr.bf16.mxu0 %v4734_v6  ;;  %4384 = vmatprep.subr.bf16.mxu1 %v4735_v8  ;;  %v4755_v6 = vld [vmem:[#allocation7 + $0x1f8] sm:$0xff]  }
 0x930   :  { %v3125_v9 = vpop.f32.mrb[40].mxu0  ;;  %v3166_v10 = vpop.f32.mrb[40].mxu1 }
 0x931   :  { %v3127_v2 = vpop.f32.mrb[41].mxu0  ;;  %v3168_v12 = vpop.f32.mrb[41].mxu1  ;;  %v3126_v29 = vadd.f32 %v3125_v9, %v2945_v34  ;;  %v3167_v47 = vadd.f32 %v3166_v10, %v2953_v35  ;;  %v4756_v10 = vld [vmem:[#allocation7 + $0x138] sm:$0xff]   ;;  %v4768_v35 = vld [vmem:[#allocation7 + $0x210] sm:$0xff]  }
 0x932   :  { %v3128_v56 = vadd.f32 %v3127_v2, %v2949_v7  ;;  %v3169_v13 = vadd.f32 %v3168_v12, %v2957_v1  ;;  %v3129_v38 = vpop.f32.mrb[42].mxu0  ;;  %v3170_v14 = vpop.f32.mrb[42].mxu1  ;;  %4363 = vmatpush3.bf16.msra.mxu0 %v4736_v15  ;;  %4385 = vmatpush3.bf16.msra.mxu1 %v4737_v41  ;;  %v4754_v1 = vld [vmem:[#allocation7 + $0x178] sm:$0xff]   ;;  %v4760_v41 = vld [vmem:[#allocation7 + $0x200] sm:$0xff]  }
 0x933   :  { %v3130_v16 = vpop.f32.mrb[43].mxu0  ;;  %v3171_v18 = vpop.f32.mrb[43].mxu1  ;;  %4364 = vmatprep.subr.bf16.mxu0 %v4738_v19  ;;  %4386 = vmatprep.subr.bf16.mxu1 %v4739_v20  ;;  %v3341_v28 = vmax.f32 %v3126_v29, 0.0  ;;  %v3343_v4 = vmax.f32 %v3167_v47, 0.0  ;;  %v4757_v2 = vld [vmem:[#allocation7 + $0x1b8] sm:$0xff]   ;;  %v4759_v38 = vld [vmem:[#allocation7 + $0x2c0] sm:$0xff]   ;;  %v2985_v20 = vrot.slane %v5296_v42, %v5160_v37 }
 0x934   :  { %v3342_v22 = vmax.f32 %v3128_v56, 0.0  ;;  %v3344_v53 = vmax.f32 %v3169_v13, 0.0  ;;  %v4758_v13 = vld [vmem:[#allocation7 + $0x240] sm:$0xff]   ;;  %v4762_v18 = vld [vmem:[#allocation7 + $0x248] sm:$0xff]   ;;  %v4769_v37 = vld [vmem:[#allocation7 + $0x290] sm:$0xff]  }
 0x935   :  { %v3357_v12 = vpack.c.bf16 %v3341_v28, %v3341_v28  ;;  %v3359_v56 = vpack.c.bf16 %v3343_v4, %v3343_v4  ;;  %v4761_v16 = vld [vmem:[#allocation7 + $0x280] sm:$0xff]   ;;  %v4763_v19 = vld [vmem:[#allocation7 + $0x2c8] sm:$0xff]   ;;  %v4782_v28 = vld [vmem:[#allocation7 + $0x270] sm:$0xff]  }
 0x936   :  { %v3358_v23 = vpack.c.bf16 %v3342_v22, %v3342_v22  ;;  %v3360_v21 = vpack.c.bf16 %v3344_v53, %v3344_v53  ;;  %4365 = vmatpush3.bf16.msra.mxu0 %v4740_v30  ;;  %4387 = vmatpush3.bf16.msra.mxu1 %v4741_v54  ;;  %v4764_v22 = vld [vmem:[#allocation7 + $0x208] sm:$0xff]   ;;  %v4767_v54 = vld [vmem:[#allocation7 + $0x2d0] sm:$0xff]   ;;  %v4774_v29 = vld [vmem:[#allocation7 + $0x260] sm:$0xff]  }
 0x937   :  { %4366 = vmatprep.subr.bf16.mxu0 %v4742_v31  ;;  %4388 = vmatprep.subr.bf16.mxu1 %v4743_v24  ;;  %v4765_v53 = vld [vmem:[#allocation7 + $0x288] sm:$0xff]   ;;  %v4775_v47 = vld [vmem:[#allocation7 + $0x2e0] sm:$0xff]  }
 0x938   :  { %3481 = vmatprep.mubr.bf16.mxu0 %v3358_v23  ;;  %3521 = vmatprep.mubr.bf16.mxu1 %v3360_v21  ;;  %v4766_v23 = vld [vmem:[#allocation7 + $0x250] sm:$0xff]  }
 0x93a   :  { %4367 = vmatpush3.bf16.msra.mxu0 %v4744_v32  ;;  %4389 = vmatpush3.bf16.msra.mxu1 %v4745_v33 }
 0x93b   :  { %4368 = vmatprep.subr.bf16.mxu0 %v4746_v39  ;;  %4390 = vmatprep.subr.bf16.mxu1 %v4747_v40 }
 0x93e   :  { %4369 = vmatpush3.bf16.msra.mxu0 %v4748_v43  ;;  %4391 = vmatpush3.bf16.msra.mxu1 %v4749_v44  ;;  %v4770_v43 = vld [vmem:[#allocation7 + $0x258] sm:$0xff]  }
 0x93f   :  { %4370 = vmatprep.subr.bf16.mxu0 %v4750_v48  ;;  %4392 = vmatprep.subr.bf16.mxu1 %v4751_v60  ;;  %v4771_v44 = vld [vmem:[#allocation7 + $0x2d8] sm:$0xff]   ;;  %v4776_v48 = vld [vmem:[#allocation7 + $0x220] sm:$0xff]   ;;  %v2961_v60 = vrot.slane %v5296_v42, %v5122_v25  ;;  %v4781_v25 = vld [vmem:[#allocation7 + $0x2a8] sm:$0xff]  }
 0x940   :  { %v5302_v49 = vpop.f32.mrb[44].mxu0  ;;  %v5304_v11 = vpop.f32.mrb[44].mxu1 }
 0x941   :  { %v3209_v27 = vpop.f32.mrb[45].mxu0  ;;  %v3250_v50 = vpop.f32.mrb[45].mxu1 }
 0x942   :  { %v3210_v52 = vadd.f32 %v3209_v27, %v2965_v45  ;;  %v3251_v55 = vadd.f32 %v3250_v50, %v2973_v46  ;;  %v3211_v57 = vpop.f32.mrb[46].mxu0  ;;  %v3252_v58 = vpop.f32.mrb[46].mxu1  ;;  %4371 = vmatpush3.bf16.msra.mxu0 %v4752_v17  ;;  %4393 = vmatpush3.bf16.msra.mxu1 %v4753_v62  ;;  %v4772_v45 = vld [vmem:[#allocation7 + $0x218] sm:$0xff]   ;;  %v4777_v27 = vld [vmem:[#allocation7 + $0x2a0] sm:$0xff]   ;;  %v4778_v50 = vld [vmem:[#allocation7 + $0x268] sm:$0xff]   ;;  %v3208_v62 = vadd.f32 %v5302_v49, %v2961_v60 }
 0x943   :  { %v3212_v63 = vpop.f32.mrb[47].mxu0  ;;  %v3253_v7 = vpop.f32.mrb[47].mxu1  ;;  %4372 = vmatprep.subr.bf16.mxu0 %v4754_v1  ;;  %4394 = vmatprep.subr.bf16.mxu1 %v4755_v6  ;;  %v4773_v46 = vld [vmem:[#allocation7 + $0x298] sm:$0xff]   ;;  %v2981_v57 = vrot.slane %v5296_v42, %v5147_v59  ;;  %v2989_v58 = vrot.slane %v5296_v42, %v5150_v61  ;;  %v4780_v17 = vld [vmem:[#allocation7 + $0x228] sm:$0xff]   ;;  %v4784_v1 = vld [vmem:[#allocation7 + $0x230] sm:$0xff]  }
 0x944   :  { %v3346_v8 = vmax.f32 %v3210_v52, 0.0  ;;  %v3348_v9 = vmax.f32 %v3251_v55, 0.0  ;;  %v2969_v52 = vrot.slane %v5296_v42, %v5125_v26  ;;  %v4779_v55 = vld [vmem:[#allocation7 + $0x2e8] sm:$0xff]   ;;  %v4783_v63 = vld [vmem:[#allocation7 + $0x2f0] sm:$0xff]   ;;  %v3345_v59 = vmax.f32 %v3208_v62, 0.0  ;;  %v4786_v61 = vld [vmem:[#allocation7 + $0x278] sm:$0xff]  }
 0x945   :  { %v4785_v6 = vld [vmem:[#allocation7 + $0x2b0] sm:$0xff]  }
 0x946   :  { %4373 = vmatpush3.bf16.msra.mxu0 %v4756_v10  ;;  %4395 = vmatpush3.bf16.msra.mxu1 %v4757_v2  ;;  %v3362_v14 = vpack.c.bf16 %v3346_v8, %v3346_v8  ;;  %v3364_v15 = vpack.c.bf16 %v3348_v9, %v3348_v9  ;;  %v3249_v4 = vadd.f32 %v5304_v11, %v2969_v52  ;;  %v4787_v9 = vld [vmem:[#allocation7 + $0x2f8] sm:$0xff]   ;;  %v4815_v60 = vld [vmem:[#allocation7 + $0x3f0] sm:$0xff]  }
 0x947   :  { %4402 = vmatprep.subr.bf16.mxu0 %v4758_v13  ;;  %4424 = vmatprep.subr.bf16.mxu1 %v4759_v38  ;;  %v4788_v2 = vld [vmem:[#allocation7 + $0x238] sm:$0xff]   ;;  %v4791_v38 = vld [vmem:[#allocation7 + $0x3c0] sm:$0xff]  }
 0x948   :  { %v3347_v8 = vmax.f32 %v3249_v4, 0.0  ;;  %v4789_v11 = vld [vmem:[#allocation7 + $0x2b8] sm:$0xff]  }
 0x949   :  { %3482 = vmatmul.mubr.bf16.vlgmr.msra.gmra.mrb[56].mxu0 %v3357_v12  ;;  %3522 = vmatmul.mubr.bf16.vlgmr.msra.gmra.mrb[56].mxu1 %v3359_v56  ;;  %v3361_v12 = vpack.c.bf16 %v3345_v59, %v3345_v59  ;;  %v4790_v56 = vld [vmem:[#allocation7 + $0x340] sm:$0xff]  }
 0x94a   :  { %4403 = vmatpush3.bf16.msra.mxu0 %v4760_v41  ;;  %3561 = vmatprep.mubr.bf16.mxu0 %v3362_v14  ;;  %v3363_v13 = vpack.c.bf16 %v3347_v8, %v3347_v8  ;;  %v4792_v41 = vld [vmem:[#allocation7 + $0x300] sm:$0xff]  }
 0x94b   :  { %4425 = vmatpush3.bf16.msra.mxu1 %v4761_v16  ;;  %3601 = vmatprep.mubr.bf16.mxu1 %v3364_v15  ;;  %v4793_v16 = vld [vmem:[#allocation7 + $0x380] sm:$0xff]  }
 0x94c   :  { %4404 = vmatprep.subr.bf16.mxu0 %v4762_v18  ;;  %4426 = vmatprep.subr.bf16.mxu1 %v4763_v19  ;;  %v4794_v18 = vld [vmem:[#allocation7 + $0x348] sm:$0xff]  }
 0x94d   :  { %v4795_v19 = vld [vmem:[#allocation7 + $0x3c8] sm:$0xff]  }
 0x94e   :  { %4405 = vmatpush3.bf16.msra.mxu0 %v4764_v22  ;;  %v4797_v22 = vld [vmem:[#allocation7 + $0x388] sm:$0xff]  }
 0x94f   :  { %4427 = vmatpush3.bf16.msra.mxu1 %v4765_v53  ;;  %4406 = vmatprep.subr.bf16.mxu0 %v4766_v23  ;;  %v4798_v53 = vld [vmem:[#allocation7 + $0x350] sm:$0xff]  }
 0x950   :  { %v5308_v21 = vpop.f32.mrb[48].mxu0  ;;  %v3330_v30 = vpop.f32.mrb[48].mxu1  ;;  %4428 = vmatprep.subr.bf16.mxu1 %v4767_v54  ;;  %v4799_v23 = vld [vmem:[#allocation7 + $0x3d0] sm:$0xff]  }
 0x951   :  { %v5310_v31 = vadd.f32 %v3330_v30, %v2985_v20  ;;  %v3291_v24 = vpop.f32.mrb[49].mxu0  ;;  %v3332_v32 = vpop.f32.mrb[49].mxu1  ;;  %v4796_v20 = vld [vmem:[#allocation7 + $0x308] sm:$0xff]   ;;  %v4800_v30 = vld [vmem:[#allocation7 + $0x310] sm:$0xff]  }
 0x952   :  { %v3293_v33 = vpop.f32.mrb[50].mxu0  ;;  %v3334_v34 = vpop.f32.mrb[50].mxu1  ;;  %4407 = vmatpush3.bf16.msra.mxu0 %v4768_v35  ;;  %v3292_v26 = vadd.f32 %v3291_v24, %v2981_v57  ;;  %v3333_v7 = vadd.f32 %v3332_v32, %v2989_v58  ;;  %v4801_v54 = vld [vmem:[#allocation7 + $0x390] sm:$0xff]   ;;  %v4802_v24 = vld [vmem:[#allocation7 + $0x358] sm:$0xff]   ;;  %v4806_v35 = vld [vmem:[#allocation7 + $0x360] sm:$0xff]  }
 0x953   :  { %4429 = vmatpush3.bf16.msra.mxu1 %v4769_v37  ;;  %v3294_v39 = vpop.f32.mrb[51].mxu0  ;;  %v3335_v40 = vpop.f32.mrb[51].mxu1  ;;  %4408 = vmatprep.subr.bf16.mxu0 %v4770_v43  ;;  %v4803_v32 = vld [vmem:[#allocation7 + $0x3d8] sm:$0xff]   ;;  %v4807_v37 = vld [vmem:[#allocation7 + $0x3e0] sm:$0xff]   ;;  %v3351_v52 = vmax.f32 %v5310_v31, 0.0 }
 0x954   :  { %4430 = vmatprep.subr.bf16.mxu1 %v4771_v44  ;;  %v3350_v49 = vmax.f32 %v3292_v26, 0.0  ;;  %v3352_v10 = vmax.f32 %v3333_v7, 0.0  ;;  %v4804_v33 = vld [vmem:[#allocation7 + $0x318] sm:$0xff]   ;;  %v4808_v39 = vld [vmem:[#allocation7 + $0x320] sm:$0xff]   ;;  %v2977_v40 = vrot.slane %v5296_v42, %v5157_v36  ;;  %v4810_v44 = vld [vmem:[#allocation7 + $0x368] sm:$0xff]  }
 0x955   :  { %v4805_v34 = vld [vmem:[#allocation7 + $0x398] sm:$0xff]   ;;  %v4809_v43 = vld [vmem:[#allocation7 + $0x3a0] sm:$0xff]   ;;  %v4817_v36 = vld [vmem:[#allocation7 + $0x3b0] sm:$0xff]  }
 0x956   :  { %4409 = vmatpush3.bf16.msra.mxu0 %v4772_v45  ;;  %v3366_v14 = vpack.c.bf16 %v3350_v49, %v3350_v49  ;;  %v3368_v15 = vpack.c.bf16 %v3352_v10, %v3352_v10  ;;  %v4811_v45 = vld [vmem:[#allocation7 + $0x3e8] sm:$0xff]   ;;  %v4818_v42 = vld [vmem:[#allocation7 + $0x378] sm:$0xff]  }
 0x957   :  { %4431 = vmatpush3.bf16.msra.mxu1 %v4773_v46  ;;  %4410 = vmatprep.subr.bf16.mxu0 %v4774_v29  ;;  %v4812_v46 = vld [vmem:[#allocation7 + $0x328] sm:$0xff]   ;;  %v3290_v29 = vadd.f32 %v5308_v21, %v2977_v40  ;;  %v4820_v57 = vld [vmem:[#allocation7 + $0x338] sm:$0xff]  }
 0x958   :  { %4432 = vmatprep.subr.bf16.mxu1 %v4775_v47  ;;  %v4813_v47 = vld [vmem:[#allocation7 + $0x3a8] sm:$0xff]   ;;  %v4821_v58 = vld [vmem:[#allocation7 + $0x3b8] sm:$0xff]  }
 0x95a   :  { %4411 = vmatpush3.bf16.msra.mxu0 %v4776_v48  ;;  %v4814_v48 = vld [vmem:[#allocation7 + $0x370] sm:$0xff]  }
 0x95b   :  { %4433 = vmatpush3.bf16.msra.mxu1 %v4777_v27  ;;  %4412 = vmatprep.subr.bf16.mxu0 %v4778_v50  ;;  %v4816_v27 = vld [vmem:[#allocation7 + $0x330] sm:$0xff]   ;;  %v3349_v50 = vmax.f32 %v3290_v29, 0.0  ;;  %v3691_v29 = vpop.permute.xlu0 %3690 }
 0x95c   :  { %4434 = vmatprep.subr.bf16.mxu1 %v4779_v55  ;;  %v4819_v55 = vld [vmem:[#allocation7 + $0x3f8] sm:$0xff]  }
 0x95d   :  { %v3365_v21 = vpack.c.bf16 %v3349_v50, %v3349_v50 }
 0x95e   :  { %4413 = vmatpush3.bf16.msra.mxu0 %v4780_v17  ;;  %v3367_v17 = vpack.c.bf16 %v3351_v52, %v3351_v52 }
 0x95f   :  { %4435 = vmatpush3.bf16.msra.mxu1 %v4781_v25  ;;  %4414 = vmatprep.subr.bf16.mxu0 %v4782_v28 }
 0x960   :  { %4436 = vmatprep.subr.bf16.mxu1 %v4783_v63 }
 0x962   :  { %4415 = vmatpush3.bf16.msra.mxu0 %v4784_v1 }
 0x963   :  { %4437 = vmatpush3.bf16.msra.mxu1 %v4785_v6  ;;  %4416 = vmatprep.subr.bf16.mxu0 %v4786_v61 }
 0x964   :  { %4438 = vmatprep.subr.bf16.mxu1 %v4787_v9 }
 0x966   :  { %4417 = vmatpush3.bf16.msra.mxu0 %v4788_v2 }
 0x967   :  { %4439 = vmatpush3.bf16.msra.mxu1 %v4789_v11  ;;  %4446 = vmatprep.subr.bf16.mxu0 %v4790_v56 }
 0x968   :  { %4468 = vmatprep.subr.bf16.mxu1 %v4791_v38 }
 0x969   :  { %3562 = vmatmul.mubr.bf16.vlgmr.msra.gmra.mrb[60].mxu0 %v3361_v12 }
 0x96a   :  { %3602 = vmatmul.mubr.bf16.vlgmr.msra.gmra.mrb[60].mxu1 %v3363_v13  ;;  %4447 = vmatpush3.bf16.msra.mxu0 %v4792_v41 }
 0x96b   :  { %3641 = vmatprep.mubr.bf16.mxu0 %v3366_v14  ;;  %4469 = vmatpush3.bf16.msra.mxu1 %v4793_v16 }
 0x96c   :  { %3681 = vmatprep.mubr.bf16.mxu1 %v3368_v15  ;;  %4448 = vmatprep.subr.bf16.mxu0 %v4794_v18 }
 0x96d   :  { %4470 = vmatprep.subr.bf16.mxu1 %v4795_v19 }
 0x96e   :  { %4449 = vmatpush3.bf16.msra.mxu0 %v4796_v20 }
 0x96f   :  { %4471 = vmatpush3.bf16.msra.mxu1 %v4797_v22  ;;  %4450 = vmatprep.subr.bf16.mxu0 %v4798_v53 }
 0x970   :  { %4472 = vmatprep.subr.bf16.mxu1 %v4799_v23 }
 0x972   :  { %4451 = vmatpush3.bf16.msra.mxu0 %v4800_v30 }
 0x973   :  { %4473 = vmatpush3.bf16.msra.mxu1 %v4801_v54  ;;  %4452 = vmatprep.subr.bf16.mxu0 %v4802_v24 }
 0x974   :  { %4474 = vmatprep.subr.bf16.mxu1 %v4803_v32 }
 0x976   :  { %4453 = vmatpush3.bf16.msra.mxu0 %v4804_v33 }
 0x977   :  { %4475 = vmatpush3.bf16.msra.mxu1 %v4805_v34  ;;  %4454 = vmatprep.subr.bf16.mxu0 %v4806_v35 }
 0x978   :  { %4476 = vmatprep.subr.bf16.mxu1 %v4807_v37 }
 0x97a   :  { %4455 = vmatpush3.bf16.msra.mxu0 %v4808_v39 }
 0x97b   :  { %4477 = vmatpush3.bf16.msra.mxu1 %v4809_v43  ;;  %4456 = vmatprep.subr.bf16.mxu0 %v4810_v44 }
 0x97c   :  { %4478 = vmatprep.subr.bf16.mxu1 %v4811_v45 }
 0x97e   :  { %4457 = vmatpush3.bf16.msra.mxu0 %v4812_v46 }
 0x97f   :  { %4479 = vmatpush3.bf16.msra.mxu1 %v4813_v47  ;;  %4458 = vmatprep.subr.bf16.mxu0 %v4814_v48 }
 0x980   :  { %4480 = vmatprep.subr.bf16.mxu1 %v4815_v60 }
 0x982   :  { %4459 = vmatpush3.bf16.msra.mxu0 %v4816_v27 }
 0x983   :  { %4481 = vmatpush3.bf16.msra.mxu1 %v4817_v36  ;;  %4460 = vmatprep.subr.bf16.mxu0 %v4818_v42 }
 0x984   :  { %4482 = vmatprep.subr.bf16.mxu1 %v4819_v55 }
 0x986   :  { %4461 = vmatpush3.bf16.msra.mxu0 %v4820_v57 }
 0x987   :  { %4483 = vmatpush3.bf16.msra.mxu1 %v4821_v58  ;;  %4519 = vmatprep.subr.bf16.mxu0 %v4948_v0 }
 0x989   :  { %3642 = vmatmul.mubr.bf16.vlgmr.msra.gmra.mrb[64].mxu0 %v3365_v21 }
 0x98a   :  { %3682 = vmatmul.mubr.bf16.vlgmr.msra.gmra.mrb[64].mxu1 %v3367_v17  ;;  %4527 = vmatprep.mubr.msk.bf16.mxu0 %vm4949_vm0, %v4948_v0  ;;  %v4677_v17 = vld [vmem:[#allocation8] sm:$0xff]  }
 0x98b   :  { %4520 = vmatpush3.bf16.msra.mxu0 %v4677_v17 }
 0x98c   :  { %4521 = vmatprep.subr.bf16.mxu0 %v4948_v0 }
 0x9fc   :  { %v4330_v62 = vpop.f32.mrb[52].mxu0  ;;  %v4352_v25 = vpop.f32.mrb[52].mxu1 }
 0x9fd   :  { %v4331_v28 = vpop.f32.mrb[53].mxu0  ;;  %v4353_v4 = vpop.f32.mrb[53].mxu1 }
 0x9fe   :  { %v4332_v31 = vadd.f32 %v4331_v28, %v4330_v62  ;;  %v4354_v63 = vadd.f32 %v4353_v4, %v4352_v25  ;;  %v4333_v26 = vpop.f32.mrb[54].mxu0  ;;  %v4355_v7 = vpop.f32.mrb[54].mxu1  ;;  %v4678_v62 = vld [vmem:[#allocation8 + $0x8] sm:$0xff]   ;;  %v4679_v25 = vld [vmem:[#allocation8 + $0x10] sm:$0xff]  }
 0x9ff   :  { %v4334_v1 = vpop.f32.mrb[55].mxu0  ;;  %v4356_v59 = vpop.f32.mrb[55].mxu1  ;;  %4522 = vmatpush3.bf16.msra.mxu0 %v4678_v62 }
 0xa00   :  { %v3444_v6 = vadd.f32 %v4354_v63, %v4332_v31  ;;  %4523 = vmatprep.subr.bf16.mxu0 %v4948_v0  ;;  %v4822_v63 = vld [vmem:[%s5367_s5 + $0x8] sm:$0x3f]  ;;  %v3726_v1 = vcombine.high %v5238_v51, %v5238_v51  ;;  %s4952_s5 = smov [#allocation10]  }
 0xa01   :  { %v3729_v26 = vcombine.high %v4822_v63, %v4822_v63  ;;  %s3830_s25 = sshll.u32 %s4952_s5, 4  ;;  %s3831_s25 = int_to_ptr.vmem [resolvable:$true] %s3830_s25 }
 0xa02   :  { %s4911_s26 = scalar_lea.vmem %s3831_s25, 16  ;;  %s4915_s27 = scalar_lea.vmem %s3831_s25, 32 }
 0xa03   :  { %4524 = vmatpush3.bf16.msra.mxu0 %v4679_v25  ;;  %v3736_v7 = vrot.slane %v3729_v26, %v5083_v5  ;;  %p4912_p4 = scmp.ne.s32.totalorder %s3831_s25, %s4911_s26  ;;  %p4916_p5 = scmp.lt.s32.totalorder %s3831_s25, %s3831_s25 }
 0xa04   :  { %4525 = vmatprep.subr.bf16.mxu0 %v4948_v0  ;;  %p4917_p6 = scmp.lt.s32.totalorder %s4915_s27, %s4911_s26 }
 0xa06   :  { %p4918_p7 = por %p4917_p6, %p4916_p5 }
 0xa08   :  { %p4919_p8 = pnand %p4918_p7, %p4912_p4 }
 0xa1c   :  { %v4374_v61 = vpop.f32.mrb[56].mxu0  ;;  %v4396_v8 = vpop.f32.mrb[56].mxu1 }
 0xa1d   :  { %v4375_v9 = vpop.f32.mrb[57].mxu0  ;;  %v4397_v49 = vpop.f32.mrb[57].mxu1 }
 0xa1e   :  { %v4376_v10 = vadd.f32 %v4375_v9, %v4374_v61  ;;  %v4398_v2 = vadd.f32 %v4397_v49, %v4396_v8  ;;  %v4377_v12 = vpop.f32.mrb[58].mxu0  ;;  %v4399_v11 = vpop.f32.mrb[58].mxu1  ;;  %v3755_v49 = vld [vmem:[%s5369_s7] sm:$0x1] }
 0xa1f   :  { %v4378_v56 = vpop.f32.mrb[59].mxu0  ;;  %v4400_v13 = vpop.f32.mrb[59].mxu1 }
 0xa20   :  { %v3484_v38 = vadd.f32 %v4376_v10, %v3444_v6  ;;  %v3743_v6 = vrot.slane %v3736_v7, %v5083_v5 }
 0xa22   :  { %v3524_v14 = vadd.f32 %v4398_v2, %v3484_v38 }
 0xa3c   :  { %v4418_v15 = vpop.f32.mrb[60].mxu0 }
 0xa3d   :  { %v4440_v41 = vpop.f32.mrb[60].mxu1  ;;  %v4419_v16 = vpop.f32.mrb[61].mxu0 }
 0xa3e   :  { %v4420_v18 = vadd.f32 %v4419_v16, %v4418_v15  ;;  %v4441_v19 = vpop.f32.mrb[61].mxu1  ;;  %v4421_v20 = vpop.f32.mrb[62].mxu0 }
 0xa3f   :  { %v4442_v22 = vadd.f32 %v4441_v19, %v4440_v41  ;;  %v4443_v53 = vpop.f32.mrb[62].mxu1  ;;  %v4422_v23 = vpop.f32.mrb[63].mxu0 }
 0xa40   :  { %v3564_v30 = vadd.f32 %v4420_v18, %v3524_v14  ;;  %v4444_v54 = vpop.f32.mrb[63].mxu1 }
 0xa42   :  { %v3604_v24 = vadd.f32 %v4442_v22, %v3564_v30 }
 0xa5c   :  { %v4462_v32 = vpop.f32.mrb[64].mxu0 }
 0xa5d   :  { %v4484_v33 = vpop.f32.mrb[64].mxu1  ;;  %v4463_v34 = vpop.f32.mrb[65].mxu0 }
 0xa5e   :  { %v4464_v35 = vadd.f32 %v4463_v34, %v4462_v32  ;;  %v4485_v37 = vpop.f32.mrb[65].mxu1  ;;  %v4465_v39 = vpop.f32.mrb[66].mxu0 }
 0xa5f   :  { %v4486_v40 = vadd.f32 %v4485_v37, %v4484_v33  ;;  %v4487_v43 = vpop.f32.mrb[66].mxu1  ;;  %v4466_v44 = vpop.f32.mrb[67].mxu0 }
 0xa60   :  { %v3644_v45 = vadd.f32 %v4464_v35, %v3604_v24  ;;  %v4488_v46 = vpop.f32.mrb[67].mxu1 }
 0xa62   :  { %v3684_v47 = vadd.f32 %v4486_v40, %v3644_v45 }
 0xa64   :  { %v3693_v48 = vadd.f32 %v3691_v29, %v3684_v47 }
 0xa66   :  { %v3701_v60 = vrot.slane %v3693_v48, %v5083_v5 }
 0xa68   :  { %v3708_v27 = vrot.slane %v3701_v60, %v5083_v5 }
 0xa6a   :  { %3709 = vrot.lane.b32.xlu1 %v3708_v27, %s4943_s16 }
 0xadc   :  { %v3710_v50 = vpop.permute.xlu1 %3709 }
 0xadd   :  { %v3712_v36 = vadd.f32 %v3710_v50, %v5242_v3  ;;  %v4680_v3 = vld [vmem:[#allocation8 + $0x18] sm:$0xff]  }
 0xade   :  { %4526 = vmatpush3.bf16.msra.mxu0 %v4680_v3 }
 0xadf   :  { %v3713_v42 = vsel %vm167_vm2, %v3712_v36, 0.0 }
 0xae0   :  { %3714 = vadd.xlane.f32.xlu1 %v3713_v42 }
 0xb6d   :  { %v3715_v52 = vpop.xlane.xlu1 %3714 }
 0xb6e   :  { %v3716_v55 = vmul.f32 0.015625, %v3715_v52 }
 0xb70   :  { %v3717_v57 = vsub.f32 %v3712_v36, %v3716_v55 }
 0xb72   :  { %v3718_v21 = vmul.f32 %v3717_v57, %v3717_v57 }
 0xb74   :  { %v3719_v58 = vsel %vm167_vm2, %v3718_v21, 0.0 }
 0xb75   :  { %3720 = vadd.xlane.f32.xlu0 %v3719_v58 }
 0xc02   :  { %v3721_v28 = vpop.xlane.xlu0 %3720 }
 0xc03   :  { %v3722_v4 = vmul.f32 0.015625, %v3721_v28 }
 0xc05   :  { %v3723_v31 = vadd.f32 1e-05, %v3722_v4 }
 0xc07   :  { %4687 = vrsqrt.f32 %v3723_v31 }
 0xc11   :  { %v4688_v59 = vpop.eup %4687 }
 0xc12   :  { %v3725_v61 = vmul.f32 %v4688_v59, %v3717_v57 }
 0xc14   :  { %v3728_v0 = vmul.f32 %v3726_v1, %v3725_v61 }
 0xc16   :  { %v3745_v8 = vadd.f32 %v3743_v6, %v3728_v0 }
 0xc18   :  { %v3746_v9 = vpack.c.bf16 %v3745_v8, %v3745_v8 }
 0xc1a   :  { %4528 = vmatmul.mubr.msk.bf16.vlgmr.msra.gmra.mrb[68].mxu0 %vm121_vm1, %v3746_v9 }
 0xced   :  { %v3817_v10 = vpop.f32.mrb[68].mxu0 }
 0xcee   :  { %v3818_v2 = vadd.f32 %v3817_v10, %v3755_v49  ;;  %v4529_v12 = vpop.f32.mrb[69].mxu0 }
 0xcef   :  { %v3820_v51 = vpop.f32.mrb[70].mxu0 }
 0xcf0   :  { %3823 = vst.msk [vmem:[#allocation10] sm:$0x1] %vm167_vm2, %v3818_v2  ;;  %v4530_v5 = vpop.f32.mrb[71].mxu0 }
 0xcf1   :  { %4922 = shalt.err (!%p4919_p8)
}
 0xcf2   :  { %s4923_s28 = scalar_lea.hbm %s5370_s8, 16 }
 0xcf3   :  { %p4924_p9 = scmp.ne.s32.totalorder %s5370_s8, %s4923_s28  ;;  %p4927_p10 = scmp.lt.u32.totalorder %s4923_s28, %s5370_s8 }
 0xcf5   :  { %p4929_p11 = pnand %p4927_p10, %p4924_p9 }
 0xcf7   :  { %4932 = shalt.err (!%p4929_p11)
}
 0xcf8   :  { %3833 = dma.vmem_to_hbm [thread:$0]  %s3831_s25, 16, %s5370_s8, [#allocation4]  }
 0xcf9   :  { %4939 = dma.done.wait [#allocation4], 16  }
 0xcfa   :  { %4940 = vsyncadd [#allocation4], 4294967280 }
 0xcfb   :  { %3837 = vsyncpa [#allocation3], 1 }
 0xcfc   :  { %3838 = vsyncpa [#allocation6], 1 }
 0xcfd   :  { %3839 = vsyncpa [#allocation9], 1 }
 0xcfe   :  { %3840 = vsyncpa [#allocation4], 1 }

</bundles_post_ra>
